<compile_context>
chip_gen: v7x
topology: tpu7x:2x2x1
jax: 0.10.0
libtpu: 0.0.40
codegen_flags: <defaults>
</compile_context>

<pallas_src>
import functools
import math

import jax
import jax.numpy as jnp
from jax import lax
from jax.experimental import pallas as pl
from jax.experimental.pallas import tpu as pltpu


def _round_up(x, m):
    return ((x + m - 1) // m) * m


def _sc_loss_kernel(fr_ref, fc_ref, lr_ref, lc_ref, out_ref,
                    m_sc, z_sc, sms_sc, nms_sc,
                    *, tau, tau_base, n_valid, tr, tc):
    i = pl.program_id(0)           # row tile index ("parallel")
    j = pl.program_id(1)           # col tile index ("arbitrary", reduction)
    neg = jnp.float32(-1e30)

    @pl.when(j == 0)
    def _():
        m_sc[...] = jnp.full_like(m_sc, neg)     # running row max
        z_sc[...] = jnp.zeros_like(z_sc)         # running sum exp (off-diag)
        sms_sc[...] = jnp.zeros_like(sms_sc)     # running sum(mask_s * sims)
        nms_sc[...] = jnp.zeros_like(nms_sc)     # running sum(mask_s)

    inv_sqrt_tau = 1.0 / math.sqrt(tau)

    def _normalize(x):
        ss = jnp.sum(x * x, axis=-1, keepdims=True)
        # rsqrt on the EUP; guard squared norm with eps^2 (matches max(norm,1e-8)).
        return (x * lax.rsqrt(jnp.maximum(ss, 1e-16))) * inv_sqrt_tau

    # cosine similarity / tau for this (row, col) tile pair — bf16 in, f32 acc.
    fnr = _normalize(fr_ref[...]).astype(jnp.bfloat16)     # (tr, Dp)
    fnc = _normalize(fc_ref[...]).astype(jnp.bfloat16)     # (tc, Dp)
    sims = lax.dot_general(fnr, fnc, (((1,), (1,)), ((), ())),
                           preferred_element_type=jnp.float32)   # (tr, tc)

    # label overlap count via indicator matmul (exact: 0/1 products, f32 acc).
    overlap = lax.dot_general(lr_ref[...], lc_ref[...], (((1,), (1,)), ((), ())),
                              preferred_element_type=jnp.float32)  # (tr, tc)

    row = lax.broadcasted_iota(jnp.int32, (tr, tc), 0) + i * tr
    col = lax.broadcasted_iota(jnp.int32, (tr, tc), 1) + j * tc
    off_diag = row != col
    col_valid = col < n_valid

    # online max (self column stays inside the max, padded columns excluded).
    m_prev = m_sc[...]
    sims_for_max = jnp.where(col_valid, sims, neg)
    m_new = jnp.maximum(m_prev, jnp.max(sims_for_max, axis=1, keepdims=True))

    # exp-sum denominator: exclude self and padded columns via additive mask.
    keep = jnp.logical_and(off_diag, col_valid)
    p = jnp.exp(jnp.where(keep, sims, neg) - m_new)
    z_sc[...] = z_sc[...] * jnp.exp(m_prev - m_new) + jnp.sum(p, axis=1, keepdims=True)
    m_sc[...] = m_new

    # positive-pair mask: shared label and not the diagonal.
    msf = jnp.where(jnp.logical_and(overlap > 0.5, off_diag),
                    jnp.float32(1.0), jnp.float32(0.0))
    sms_sc[...] += jnp.sum(msf * sims, axis=1, keepdims=True)
    nms_sc[...] += jnp.sum(msf, axis=1, keepdims=True)

    @pl.when(j == pl.num_programs(1) - 1)
    def _():
        n_ms = nms_sc[...]
        denom = jnp.where(n_ms == 0.0, jnp.float32(1.0), n_ms)
        lse = m_sc[...] + jnp.log(z_sc[...])
        # sum(mask * log_prob) = sum(mask * sims) - count * logsumexp(off-diag)
        sum_mlogp = sms_sc[...] - n_ms * lse
        log_prob1 = sum_mlogp * pl.reciprocal(denom, approx=True)
        loss_rows = (-(tau / tau_base)) * log_prob1                 # (tr, 1)
        rows = lax.broadcasted_iota(jnp.int32, (tr, 1), 0) + i * tr
        out_ref[...] = jnp.where(rows < n_valid, loss_rows, jnp.float32(0.0))


def sc_loss_pallas(features, labels, tau=2.0, tau_base=1.0, block=128):
    """SCLoss forward. features: (N, D) float; labels: (N, C) multi-hot ints."""
    n, d = features.shape
    c = labels.shape[1]
    tr = tc = int(block)
    n_pad = _round_up(max(n, 1), tr)
    dp = _round_up(d, 128)
    cp = _round_up(c, 128)

    # zero-padding does not change norms, dot products, or the overlap mask;
    # padded rows are masked out of the final mean inside the kernel.
    f = jnp.zeros((n_pad, dp), jnp.float32).at[:n, :d].set(
        features.astype(jnp.float32))
    # 0/1 multi-hot indicator: overlap test becomes an MXU matmul.
    # TODO(synk): if labels can hold arbitrary ints whose bit patterns never
    # overlap, torch's bitwise `&` differs; multi-hot 0/1 labels are assumed.
    ind = jnp.zeros((n_pad, cp), jnp.bfloat16).at[:n, :c].set(
        (labels != 0).astype(jnp.bfloat16))

    nr = n_pad // tr
    nc = n_pad // tc
    kernel = functools.partial(_sc_loss_kernel, tau=float(tau),
                               tau_base=float(tau_base), n_valid=n, tr=tr, tc=tc)

    per_row = pl.pallas_call(
        kernel,
        out_shape=jax.ShapeDtypeStruct((n_pad, 1), jnp.float32),
        grid_spec=pltpu.PrefetchScalarGridSpec(
            num_scalar_prefetch=0,
            grid=(nr, nc),
            in_specs=[
                pl.BlockSpec((tr, dp), lambda i, j: (i, 0)),   # row features
                pl.BlockSpec((tc, dp), lambda i, j: (j, 0)),   # col features
                pl.BlockSpec((tr, cp), lambda i, j: (i, 0)),   # row indicator
                pl.BlockSpec((tc, cp), lambda i, j: (j, 0)),   # col indicator
            ],
            out_specs=pl.BlockSpec((tr, 1), lambda i, j: (i, 0)),
            scratch_shapes=[pltpu.VMEM((tr, 1), jnp.float32)] * 4,
        ),
        compiler_params=pltpu.CompilerParams(
            dimension_semantics=("parallel", "arbitrary")),
    )(f, f, ind, ind)

    return jnp.sum(per_row) / float(n)


def sc_loss_ref(features, labels, tau=2.0, tau_base=1.0):
    """Plain-JAX reference mirroring the PyTorch forward (f32 throughout)."""
    labels = labels.astype(jnp.int32)
    n = features.shape[0]
    shared = jnp.bitwise_and(labels[:, None, :], labels[None, :, :])
    mask_s = jnp.any(shared != 0, axis=-1).astype(jnp.float32)
    mask_s = mask_s * (1.0 - jnp.eye(n, dtype=jnp.float32))
    fn = features / jnp.maximum(
        jnp.sqrt(jnp.sum(features * features, axis=-1, keepdims=True)), 1e-8)
    sims = fn @ fn.T / tau
    logits_max = jnp.max(sims, axis=1, keepdims=True)
    logits = sims - logits_max
    logits_mask = 1.0 - jnp.eye(n, dtype=jnp.float32)
    exp_logits = jnp.exp(logits) * logits_mask
    log_prob = logits - jnp.log(jnp.sum(exp_logits, axis=1, keepdims=True))
    denom = jnp.sum(mask_s, axis=1)
    denom = jnp.where(denom == 0.0, 1.0, denom)
    log_prob1 = jnp.sum(mask_s * log_prob, axis=1) / denom
    loss = -(tau / tau_base) * log_prob1
    return jnp.mean(loss)


if __name__ == "__main__":
    key = jax.random.PRNGKey(0)
    k1, k2, k3, k4 = jax.random.split(key, 4)

    # Small shapes implied by the forward: batch=8 samples, hidden=32, 4 classes.
    N, D, C = 8, 32, 4
    feats = jax.random.normal(k1, (N, D), dtype=jnp.float32)
    labs = jax.random.bernoulli(k2, 0.5, (N, C)).astype(jnp.int32)

    loss = jax.block_until_ready(sc_loss_pallas(feats, labs, tau=2.0, tau_base=1.0))
    ref = jax.block_until_ready(sc_loss_ref(feats, labs, tau=2.0, tau_base=1.0))
    assert jnp.allclose(loss, ref, rtol=3e-2, atol=3e-2), (loss, ref)

    # Exercise the multi-tile online-LSE path plus row/column padding.
    N2, D2, C2 = 20, 48, 6
    feats2 = jax.random.normal(k3, (N2, D2), dtype=jnp.float32)
    labs2 = jax.random.bernoulli(k4, 0.4, (N2, C2)).astype(jnp.int32)
    loss2 = jax.block_until_ready(
        sc_loss_pallas(feats2, labs2, tau=2.0, tau_base=1.0, block=8))
    ref2 = jax.block_until_ready(sc_loss_ref(feats2, labs2, tau=2.0, tau_base=1.0))
    assert jnp.allclose(loss2, ref2, rtol=3e-2, atol=3e-2), (loss2, ref2)

    print("KERNEL_OK")
</pallas_src>

<mosaic_0001>
module attributes {stable_mosaic.version = 11 : i64} {
  func.func @_sc_loss_kernel(%arg0: i32, %arg1: i32, %arg2: memref<128x128xf32, #tpu.memory_space<vmem>>, %arg3: memref<128x128xf32, #tpu.memory_space<vmem>>, %arg4: memref<128x128xbf16, #tpu.memory_space<vmem>>, %arg5: memref<128x128xbf16, #tpu.memory_space<vmem>>, %arg6: memref<128x1xf32, #tpu.memory_space<vmem>>, %arg7: memref<128x1xf32, #tpu.memory_space<vmem>>, %arg8: memref<128x1xf32, #tpu.memory_space<vmem>>, %arg9: memref<128x1xf32, #tpu.memory_space<vmem>>, %arg10: memref<128x1xf32, #tpu.memory_space<vmem>>) attributes {dimension_semantics = [#tpu.dimension_semantics<parallel>, #tpu.dimension_semantics<arbitrary>], iteration_bounds = array<i64: 1, 1>, scalar_prefetch = 0 : i64, scratch_operands = 4 : i64, tpu.core_type = #tpu.core_type<tc>, window_params = [{transform_indices = @transform_0, window_bounds = array<i64: 128, 128>}, {transform_indices = @transform_1, window_bounds = array<i64: 128, 128>}, {transform_indices = @transform_2, window_bounds = array<i64: 128, 128>}, {transform_indices = @transform_3, window_bounds = array<i64: 128, 128>}, {transform_indices = @transform_4, window_bounds = array<i64: 128, 1>}]} {
    %c0_i32 = arith.constant 0 : i32
    %0 = arith.cmpi eq, %arg1, %c0_i32 : i32
    %1 = arith.extui %0 : i1 to i32
    %cst = arith.constant -1.000000e+30 : f32
    %c0_i32_0 = arith.constant 0 : i32
    %2 = arith.cmpi ne, %1, %c0_i32_0 : i32
    scf.if %2 {
      %83 = vector.broadcast %cst : f32 to vector<128x1xf32>
      %c0_44 = arith.constant 0 : index
      %c0_45 = arith.constant 0 : index
      %84 = vector.load %arg7[%c0_44, %c0_45] : memref<128x1xf32, #tpu.memory_space<vmem>>, vector<128x1xf32>
      tpu.vector_store %arg7[%c0_44, %c0_45], %83 {strides = array<i32>} : memref<128x1xf32, #tpu.memory_space<vmem>>, vector<128x1xf32>,
      %cst_46 = arith.constant 0.000000e+00 : f32
      %85 = vector.broadcast %cst_46 : f32 to vector<128x1xf32>
      %c0_47 = arith.constant 0 : index
      %c0_48 = arith.constant 0 : index
      %86 = vector.load %arg8[%c0_47, %c0_48] : memref<128x1xf32, #tpu.memory_space<vmem>>, vector<128x1xf32>
      tpu.vector_store %arg8[%c0_47, %c0_48], %85 {strides = array<i32>} : memref<128x1xf32, #tpu.memory_space<vmem>>, vector<128x1xf32>,
      %cst_49 = arith.constant 0.000000e+00 : f32
      %87 = vector.broadcast %cst_49 : f32 to vector<128x1xf32>
      %c0_50 = arith.constant 0 : index
      %c0_51 = arith.constant 0 : index
      %88 = vector.load %arg9[%c0_50, %c0_51] : memref<128x1xf32, #tpu.memory_space<vmem>>, vector<128x1xf32>
      tpu.vector_store %arg9[%c0_50, %c0_51], %87 {strides = array<i32>} : memref<128x1xf32, #tpu.memory_space<vmem>>, vector<128x1xf32>,
      %cst_52 = arith.constant 0.000000e+00 : f32
      %89 = vector.broadcast %cst_52 : f32 to vector<128x1xf32>
      %c0_53 = arith.constant 0 : index
      %c0_54 = arith.constant 0 : index
      %90 = vector.load %arg10[%c0_53, %c0_54] : memref<128x1xf32, #tpu.memory_space<vmem>>, vector<128x1xf32>
      tpu.vector_store %arg10[%c0_53, %c0_54], %89 {strides = array<i32>} : memref<128x1xf32, #tpu.memory_space<vmem>>, vector<128x1xf32>,
    } else {
    }
    %c0 = arith.constant 0 : index
    %c0_1 = arith.constant 0 : index
    %3 = vector.load %arg2[%c0, %c0_1] : memref<128x128xf32, #tpu.memory_space<vmem>>, vector<128x128xf32>
    %4 = arith.mulf %3, %3 : vector<128x128xf32>
    %cst_2 = arith.constant dense<0.000000e+00> : vector<128xf32>
    %5 = vector.multi_reduction <add>, %4, %cst_2 [1] : vector<128x128xf32> to vector<128xf32>
    %6 = vector.shape_cast %5 : vector<128xf32> to vector<128x1xf32>
    %cst_3 = arith.constant 1.000000e-16 : f32
    %7 = vector.broadcast %cst_3 : f32 to vector<128x1xf32>
    %8 = arith.maximumf %6, %7 : vector<128x1xf32>
    %9 = math.rsqrt %8 : vector<128x1xf32>
    %10 = vector.broadcast %9 : vector<128x1xf32> to vector<128x128xf32>
    %11 = arith.mulf %3, %10 : vector<128x128xf32>
    %cst_4 = arith.constant 0.707106769 : f32
    %12 = vector.broadcast %cst_4 : f32 to vector<128x128xf32>
    %13 = arith.mulf %11, %12 : vector<128x128xf32>
    %14 = arith.truncf %13 : vector<128x128xf32> to vector<128x128xbf16>
    %c0_5 = arith.constant 0 : index
    %c0_6 = arith.constant 0 : index
    %15 = vector.load %arg3[%c0_5, %c0_6] : memref<128x128xf32, #tpu.memory_space<vmem>>, vector<128x128xf32>
    %16 = arith.mulf %15, %15 : vector<128x128xf32>
    %cst_7 = arith.constant dense<0.000000e+00> : vector<128xf32>
    %17 = vector.multi_reduction <add>, %16, %cst_7 [1] : vector<128x128xf32> to vector<128xf32>
    %18 = vector.shape_cast %17 : vector<128xf32> to vector<128x1xf32>
    %cst_8 = arith.constant 1.000000e-16 : f32
    %19 = vector.broadcast %cst_8 : f32 to vector<128x1xf32>
    %20 = arith.maximumf %18, %19 : vector<128x1xf32>
    %21 = math.rsqrt %20 : vector<128x1xf32>
    %22 = vector.broadcast %21 : vector<128x1xf32> to vector<128x128xf32>
    %23 = arith.mulf %15, %22 : vector<128x128xf32>
    %cst_9 = arith.constant 0.707106769 : f32
    %24 = vector.broadcast %cst_9 : f32 to vector<128x128xf32>
    %25 = arith.mulf %23, %24 : vector<128x128xf32>
    %26 = arith.truncf %25 : vector<128x128xf32> to vector<128x128xbf16>
    %cst_10 = arith.constant dense<0.000000e+00> : vector<128x128xf32>
    %27 = tpu.matmul %14, %26, %cst_10 {dimension_numbers = #tpu.dot_dimension_numbers<[1], [1], [0], [0], [0, 0, 1, 0], [], []>} : vector<128x128xbf16>, vector<128x128xbf16>, vector<128x128xf32> -> vector<128x128xf32>
    %c0_11 = arith.constant 0 : index
    %c0_12 = arith.constant 0 : index
    %28 = vector.load %arg4[%c0_11, %c0_12] : memref<128x128xbf16, #tpu.memory_space<vmem>>, vector<128x128xbf16>
    %c0_13 = arith.constant 0 : index
    %c0_14 = arith.constant 0 : index
    %29 = vector.load %arg5[%c0_13, %c0_14] : memref<128x128xbf16, #tpu.memory_space<vmem>>, vector<128x128xbf16>
    %cst_15 = arith.constant dense<0.000000e+00> : vector<128x128xf32>
    %30 = tpu.matmul %28, %29, %cst_15 {dimension_numbers = #tpu.dot_dimension_numbers<[1], [1], [0], [0], [0, 0, 1, 0], [], []>} : vector<128x128xbf16>, vector<128x128xbf16>, vector<128x128xf32> -> vector<128x128xf32>
    %31 = tpu.iota {dimensions = array<i32: 0>} : vector<128x128xi32>
    %c128_i32 = arith.constant 128 : i32
    %32 = arith.muli %arg0, %c128_i32 : i32
    %33 = vector.broadcast %32 : i32 to vector<128x128xi32>
    %34 = arith.addi %31, %33 : vector<128x128xi32>
    %35 = tpu.iota {dimensions = array<i32: 1>} : vector<128x128xi32>
    %c128_i32_16 = arith.constant 128 : i32
    %36 = arith.muli %arg1, %c128_i32_16 : i32
    %37 = vector.broadcast %36 : i32 to vector<128x128xi32>
    %38 = arith.addi %35, %37 : vector<128x128xi32>
    %39 = arith.cmpi ne, %34, %38 : vector<128x128xi32>
    %c8_i32 = arith.constant 8 : i32
    %40 = vector.broadcast %c8_i32 : i32 to vector<128x128xi32>
    %41 = arith.cmpi slt, %38, %40 : vector<128x128xi32>
    %c0_17 = arith.constant 0 : index
    %c0_18 = arith.constant 0 : index
    %42 = vector.load %arg7[%c0_17, %c0_18] : memref<128x1xf32, #tpu.memory_space<vmem>>, vector<128x1xf32>
    %cst_19 = arith.constant -1.000000e+30 : f32
    %43 = vector.broadcast %cst_19 : f32 to vector<128x128xf32>
    %44 = arith.select %41, %27, %43 : vector<128x128xi1>, vector<128x128xf32>
    %cst_20 = arith.constant dense<0xFF800000> : vector<128xf32>
    %45 = vector.multi_reduction <maximumf>, %44, %cst_20 [1] : vector<128x128xf32> to vector<128xf32>
    %46 = vector.shape_cast %45 : vector<128xf32> to vector<128x1xf32>
    %47 = arith.maximumf %42, %46 : vector<128x1xf32>
    %48 = arith.andi %39, %41 : vector<128x128xi1>
    %cst_21 = arith.constant -1.000000e+30 : f32
    %49 = vector.broadcast %cst_21 : f32 to vector<128x128xf32>
    %50 = arith.select %48, %27, %49 : vector<128x128xi1>, vector<128x128xf32>
    %51 = vector.broadcast %47 : vector<128x1xf32> to vector<128x128xf32>
    %52 = arith.subf %50, %51 : vector<128x128xf32>
    %53 = math.exp %52 : vector<128x128xf32>
    %c0_22 = arith.constant 0 : index
    %c0_23 = arith.constant 0 : index
    %54 = vector.load %arg8[%c0_22, %c0_23] : memref<128x1xf32, #tpu.memory_space<vmem>>, vector<128x1xf32>
    %55 = arith.subf %42, %47 : vector<128x1xf32>
    %56 = math.exp %55 : vector<128x1xf32>
    %57 = arith.mulf %54, %56 : vector<128x1xf32>
    %cst_24 = arith.constant dense<0.000000e+00> : vector<128xf32>
    %58 = vector.multi_reduction <add>, %53, %cst_24 [1] : vector<128x128xf32> to vector<128xf32>
    %59 = vector.shape_cast %58 : vector<128xf32> to vector<128x1xf32>
    %60 = arith.addf %57, %59 : vector<128x1xf32>
    %c0_25 = arith.constant 0 : index
    %c0_26 = arith.constant 0 : index
    %61 = vector.load %arg8[%c0_25, %c0_26] : memref<128x1xf32, #tpu.memory_space<vmem>>, vector<128x1xf32>
    tpu.vector_store %arg8[%c0_25, %c0_26], %60 {strides = array<i32>} : memref<128x1xf32, #tpu.memory_space<vmem>>, vector<128x1xf32>,
    %c0_27 = arith.constant 0 : index
    %c0_28 = arith.constant 0 : index
    %62 = vector.load %arg7[%c0_27, %c0_28] : memref<128x1xf32, #tpu.memory_space<vmem>>, vector<128x1xf32>
    tpu.vector_store %arg7[%c0_27, %c0_28], %47 {strides = array<i32>} : memref<128x1xf32, #tpu.memory_space<vmem>>, vector<128x1xf32>,
    %cst_29 = arith.constant 5.000000e-01 : f32
    %63 = vector.broadcast %cst_29 : f32 to vector<128x128xf32>
    %64 = arith.cmpf ogt, %30, %63 : vector<128x128xf32>
    %65 = arith.andi %64, %39 : vector<128x128xi1>
    %cst_30 = arith.constant 1.000000e+00 : f32
    %cst_31 = arith.constant 0.000000e+00 : f32
    %66 = vector.broadcast %cst_30 : f32 to vector<128x128xf32>
    %67 = vector.broadcast %cst_31 : f32 to vector<128x128xf32>
    %68 = arith.select %65, %66, %67 : vector<128x128xi1>, vector<128x128xf32>
    %c0_32 = arith.constant 0 : index
    %c0_33 = arith.constant 0 : index
    %69 = vector.load %arg9[%c0_32, %c0_33] : memref<128x1xf32, #tpu.memory_space<vmem>>, vector<128x1xf32>
    %70 = arith.mulf %68, %27 : vector<128x128xf32>
    %cst_34 = arith.constant dense<0.000000e+00> : vector<128xf32>
    %71 = vector.multi_reduction <add>, %70, %cst_34 [1] : vector<128x128xf32> to vector<128xf32>
    %72 = vector.shape_cast %71 : vector<128xf32> to vector<128x1xf32>
    %73 = arith.addf %69, %72 : vector<128x1xf32>
    %c0_35 = arith.constant 0 : index
    %c0_36 = arith.constant 0 : index
    %74 = vector.load %arg9[%c0_35, %c0_36] : memref<128x1xf32, #tpu.memory_space<vmem>>, vector<128x1xf32>
    tpu.vector_store %arg9[%c0_35, %c0_36], %73 {strides = array<i32>} : memref<128x1xf32, #tpu.memory_space<vmem>>, vector<128x1xf32>,
    %c0_37 = arith.constant 0 : index
    %c0_38 = arith.constant 0 : index
    %75 = vector.load %arg10[%c0_37, %c0_38] : memref<128x1xf32, #tpu.memory_space<vmem>>, vector<128x1xf32>
    %cst_39 = arith.constant dense<0.000000e+00> : vector<128xf32>
    %76 = vector.multi_reduction <add>, %68, %cst_39 [1] : vector<128x128xf32> to vector<128xf32>
    %77 = vector.shape_cast %76 : vector<128xf32> to vector<128x1xf32>
    %78 = arith.addf %75, %77 : vector<128x1xf32>
    %c0_40 = arith.constant 0 : index
    %c0_41 = arith.constant 0 : index
    %79 = vector.load %arg10[%c0_40, %c0_41] : memref<128x1xf32, #tpu.memory_space<vmem>>, vector<128x1xf32>
    tpu.vector_store %arg10[%c0_40, %c0_41], %78 {strides = array<i32>} : memref<128x1xf32, #tpu.memory_space<vmem>>, vector<128x1xf32>,
    %c0_i32_42 = arith.constant 0 : i32
    %80 = arith.cmpi eq, %arg1, %c0_i32_42 : i32
    %81 = arith.extui %80 : i1 to i32
    %c0_i32_43 = arith.constant 0 : i32
    %82 = arith.cmpi ne, %81, %c0_i32_43 : i32
    scf.if %82 {
      %c0_44 = arith.constant 0 : index
      %c0_45 = arith.constant 0 : index
      %83 = vector.load %arg10[%c0_44, %c0_45] : memref<128x1xf32, #tpu.memory_space<vmem>>, vector<128x1xf32>
      %cst_46 = arith.constant 0.000000e+00 : f32
      %84 = vector.broadcast %cst_46 : f32 to vector<128x1xf32>
      %85 = arith.cmpf oeq, %83, %84 : vector<128x1xf32>
      %cst_47 = arith.constant 1.000000e+00 : f32
      %86 = vector.broadcast %cst_47 : f32 to vector<128x1xf32>
      %87 = arith.select %85, %86, %83 : vector<128x1xi1>, vector<128x1xf32>
      %c0_48 = arith.constant 0 : index
      %c0_49 = arith.constant 0 : index
      %88 = vector.load %arg7[%c0_48, %c0_49] : memref<128x1xf32, #tpu.memory_space<vmem>>, vector<128x1xf32>
      %c0_50 = arith.constant 0 : index
      %c0_51 = arith.constant 0 : index
      %89 = vector.load %arg8[%c0_50, %c0_51] : memref<128x1xf32, #tpu.memory_space<vmem>>, vector<128x1xf32>
      %90 = math.log %89 : vector<128x1xf32>
      %91 = arith.addf %88, %90 : vector<128x1xf32>
      %c0_52 = arith.constant 0 : index
      %c0_53 = arith.constant 0 : index
      %92 = vector.load %arg9[%c0_52, %c0_53] : memref<128x1xf32, #tpu.memory_space<vmem>>, vector<128x1xf32>
      %93 = arith.mulf %83, %91 : vector<128x1xf32>
      %94 = arith.subf %92, %93 : vector<128x1xf32>
      %95 = tpu.reciprocal %87 {approx = true} : vector<128x1xf32> -> vector<128x1xf32>
      %96 = arith.mulf %94, %95 : vector<128x1xf32>
      %cst_54 = arith.constant -2.000000e+00 : f32
      %97 = vector.broadcast %cst_54 : f32 to vector<128x1xf32>
      %98 = arith.mulf %97, %96 : vector<128x1xf32>
      %99 = tpu.iota {dimensions = array<i32: 0>} : vector<128x1xi32>
      %c128_i32_55 = arith.constant 128 : i32
      %100 = arith.muli %arg0, %c128_i32_55 : i32
      %101 = vector.broadcast %100 : i32 to vector<128x1xi32>
      %102 = arith.addi %99, %101 : vector<128x1xi32>
      %c8_i32_56 = arith.constant 8 : i32
      %103 = vector.broadcast %c8_i32_56 : i32 to vector<128x1xi32>
      %104 = arith.cmpi slt, %102, %103 : vector<128x1xi32>
      %cst_57 = arith.constant 0.000000e+00 : f32
      %105 = vector.broadcast %cst_57 : f32 to vector<128x1xf32>
      %106 = arith.select %104, %98, %105 : vector<128x1xi1>, vector<128x1xf32>
      %c0_58 = arith.constant 0 : index
      %c0_59 = arith.constant 0 : index
      %107 = vector.load %arg6[%c0_58, %c0_59] : memref<128x1xf32, #tpu.memory_space<vmem>>, vector<128x1xf32>
      tpu.vector_store %arg6[%c0_58, %c0_59], %106 {strides = array<i32>} : memref<128x1xf32, #tpu.memory_space<vmem>>, vector<128x1xf32>,
    } else {
    }
    return
  }
  func.func @transform_0(%arg0: i32, %arg1: i32) -> (i32, i32) {
    %c0_i32 = arith.constant 0 : i32
    %c0_i32_0 = arith.constant 0 : i32
    return %arg0, %c0_i32 : i32, i32
  }
  func.func @transform_1(%arg0: i32, %arg1: i32) -> (i32, i32) {
    %c0_i32 = arith.constant 0 : i32
    %c0_i32_0 = arith.constant 0 : i32
    return %arg1, %c0_i32 : i32, i32
  }
  func.func @transform_2(%arg0: i32, %arg1: i32) -> (i32, i32) {
    %c0_i32 = arith.constant 0 : i32
    %c0_i32_0 = arith.constant 0 : i32
    return %arg0, %c0_i32 : i32, i32
  }
  func.func @transform_3(%arg0: i32, %arg1: i32) -> (i32, i32) {
    %c0_i32 = arith.constant 0 : i32
    %c0_i32_0 = arith.constant 0 : i32
    return %arg1, %c0_i32 : i32, i32
  }
  func.func @transform_4(%arg0: i32, %arg1: i32) -> (i32, i32) {
    %c0_i32 = arith.constant 0 : i32
    %c0_i32_0 = arith.constant 0 : i32
    return %arg0, %c0_i32 : i32, i32
  }
}

</mosaic_0001>

<bundles_post_ra>
// kernel: tpu_custom_call.1
= control target key start
LH: loop header
LB: loop body
LE: loop exit
PB: predicated region body
PF: predicated region fallthrough
CT: control target
= control target key end

     0   :  { %9 = vsyncpa [#allocation7], 0  ;;  %s3363_s0 = inlined_call_operand.hbm [shape: f32[128,128], index: 0, kind: input, shape index: {}]   ;;  %s3364_s1 = inlined_call_operand.hbm [shape: f32[128,128], index: 1, kind: input, shape index: {}]   ;;  %s3365_s2 = inlined_call_operand.hbm [shape: bf16[128,128], index: 2, kind: input, shape index: {}]   ;;  %s3366_s3 = inlined_call_operand.hbm [shape: bf16[128,128], index: 3, kind: input, shape index: {}]   ;;  %s3367_s4 = inlined_call_operand.vmem [shape: f32[128,1], index: 4, kind: output, shape index: {}]  }
   0x1   :  { %10 = vsyncpa [#allocation9], 0 }
   0x2   :  { %11 = vsyncpa [#allocation12], 0  ;;  %s2067_s15 = smov [#allocation8]   ;;  %s2068_s17 = smov [#allocation6]  }
   0x3   :  { %s29_s16 = sshll.u32 %s2067_s15, 4  ;;  %s17_s18 = sshll.u32 %s2068_s17, 4  ;;  %s30_s16 = int_to_ptr.vmem [resolvable:$true] %s29_s16  ;;  %s2103_s18 = int_to_ptr.vmem [resolvable:$true] %s17_s18 }
   0x4   :  { %s1973_s21 = scalar_lea.hbm %s3364_s1, 2048 }
   0x5   :  { %p1974_p0 = scmp.ne.s32.totalorder %s3364_s1, %s1973_s21  ;;  %p1977_p1 = scmp.lt.u32.totalorder %s1973_s21, %s3364_s1 }
   0x7   :  { %p1979_p2 = pnand %p1977_p1, %p1974_p0 }
   0x9   :  { %1982 = shalt.err (!%p1979_p2)
}
   0xa   :  { %s1983_s26 = scalar_lea.vmem %s30_s16, 2048  ;;  %p1988_p4 = scmp.lt.s32.totalorder %s30_s16, %s30_s16 }
   0xb   :  { %p1984_p3 = scmp.ne.s32.totalorder %s30_s16, %s1983_s26  ;;  %p1989_p5 = scmp.lt.s32.totalorder %s1983_s26, %s1983_s26 }
   0xd   :  { %p1990_p6 = por %p1989_p5, %p1988_p4 }
   0xf   :  { %p1991_p7 = pnand %p1990_p6, %p1984_p3 }
  0x11   :  { %1994 = shalt.err (!%p1991_p7)
}
  0x12   :  { %s2069_s27 = smov 128   ;;  %s2070_s28 = smov 8  }
  0x13   :  { %35 = dma.hbm_to_vmem [thread:$0]  %s3364_s1, 2048, %s30_s16, [#allocation9], %s2069_s27, %s2069_s27, %s2070_s28  }
  0x14   :  { %s1995_s7 = scalar_lea.hbm %s3363_s0, 2048 }
  0x15   :  { %p1996_p8 = scmp.ne.s32.totalorder %s3363_s0, %s1995_s7  ;;  %p1999_p9 = scmp.lt.u32.totalorder %s1995_s7, %s3363_s0 }
  0x17   :  { %p2001_p10 = pnand %p1999_p9, %p1996_p8 }
  0x19   :  { %2004 = shalt.err (!%p2001_p10)
}
  0x1a   :  { %s2005_s12 = scalar_lea.vmem %s2103_s18, 2048  ;;  %p2010_p12 = scmp.lt.s32.totalorder %s2103_s18, %s2103_s18 }
  0x1b   :  { %p2006_p11 = scmp.ne.s32.totalorder %s2103_s18, %s2005_s12  ;;  %p2011_p13 = scmp.lt.s32.totalorder %s2005_s12, %s2005_s12 }
  0x1d   :  { %p2012_p0 = por %p2011_p13, %p2010_p12 }
  0x1f   :  { %p2013_p1 = pnand %p2012_p0, %p2006_p11 }
  0x21   :  { %2016 = shalt.err (!%p2013_p1)
}
  0x22   :  { %23 = dma.hbm_to_vmem [thread:$0]  %s3363_s0, 2048, %s2103_s18, [#allocation7], %s2069_s27, %s2069_s27, %s2070_s28  }
  0x23   :  { %s2071_s14 = smov [#allocation10]   ;;  %s2017_s19 = scalar_lea.hbm %s3365_s2, 1024 }
  0x24   :  { %s41_s15 = sshll.u32 %s2071_s14, 4  ;;  %p2018_p2 = scmp.ne.s32.totalorder %s3365_s2, %s2017_s19  ;;  %s42_s15 = int_to_ptr.vmem [resolvable:$true] %s41_s15 }
  0x25   :  { %p2021_p3 = scmp.lt.u32.totalorder %s2017_s19, %s3365_s2 }
  0x27   :  { %p2023_p4 = pnand %p2021_p3, %p2018_p2 }
  0x29   :  { %2026 = shalt.err (!%p2023_p4)
}
  0x2a   :  { %s2027_s24 = scalar_lea.vmem %s42_s15, 1024  ;;  %p2032_p6 = scmp.lt.s32.totalorder %s42_s15, %s42_s15 }
  0x2b   :  { %p2028_p5 = scmp.ne.s32.totalorder %s42_s15, %s2027_s24  ;;  %p2033_p7 = scmp.lt.s32.totalorder %s2027_s24, %s2027_s24 }
  0x2d   :  { %p2034_p8 = por %p2033_p7, %p2032_p6 }
  0x2f   :  { %p2035_p9 = pnand %p2034_p8, %p2028_p5 }
  0x31   :  { %2038 = shalt.err (!%p2035_p9)
}
  0x32   :  { %s2072_s0 = smov 64   ;;  %s2073_s18 = smov 4  }
  0x33   :  { %47 = dma.hbm_to_vmem [thread:$0]  %s3365_s2, 1024, %s42_s15, [#allocation9], %s2072_s0, %s2072_s0, %s2073_s18  }
  0x34   :  { %s2074_s27 = smov [#allocation11]   ;;  %s2039_s5 = scalar_lea.hbm %s3366_s3, 1024 }
  0x35   :  { %s53_s28 = sshll.u32 %s2074_s27, 4  ;;  %p2040_p10 = scmp.ne.s32.totalorder %s3366_s3, %s2039_s5  ;;  %s54_s28 = int_to_ptr.vmem [resolvable:$true] %s53_s28 }
  0x36   :  { %p2043_p11 = scmp.lt.u32.totalorder %s2039_s5, %s3366_s3 }
  0x38   :  { %p2045_p12 = pnand %p2043_p11, %p2040_p10 }
  0x3a   :  { %2048 = shalt.err (!%p2045_p12)
}
  0x3b   :  { %s2049_s10 = scalar_lea.vmem %s54_s28, 1024  ;;  %p2054_p0 = scmp.lt.s32.totalorder %s54_s28, %s54_s28 }
  0x3c   :  { %p2050_p13 = scmp.ne.s32.totalorder %s54_s28, %s2049_s10  ;;  %p2055_p1 = scmp.lt.s32.totalorder %s2049_s10, %s2049_s10 }
  0x3e   :  { %p2056_p2 = por %p2055_p1, %p2054_p0 }
  0x40   :  { %p2057_p3 = pnand %p2056_p2, %p2050_p13 }
  0x42   :  { %2060 = shalt.err (!%p2057_p3)
}
  0x43   :  { %59 = dma.hbm_to_vmem [thread:$0]  %s3366_s3, 1024, %s54_s28, [#allocation12], %s2072_s0, %s2072_s0, %s2073_s18  }
  0x44   :  { %2061 = dma.done.wait [#allocation7], 2048  }
  0x45   :  { %2062 = vsyncadd [#allocation7], 4294965248 }
  0x46   :  { %2063 = dma.done.wait [#allocation9], 3072  }
  0x47   :  { %2064 = vsyncadd [#allocation9], 4294964224 }
  0x48   :  { %2065 = dma.done.wait [#allocation12], 1024  }
  0x49   :  { %2066 = vsyncadd [#allocation12], 4294966272  ;;  %vm3369_vm0 = vcmask 7168   ;;  %v2075_v0 = vmov 0.0   ;;  %v2329_v1 = vld [vmem:[#allocation8] sm:$0xff]  ;;  %v2331_v2 = vld [vmem:[#allocation8 + $0x10] sm:$0xff] }
  0x4a   :  { %1678 = vst.msk [vmem:[%s3367_s4 + $0x8] sm:$0xff] %vm3369_vm0, %v2075_v0  ;;  %1679 = vst.msk [vmem:[%s3367_s4 + $0x10] sm:$0xff] %vm3369_vm0, %v2075_v0  ;;  %v2333_v3 = vld [vmem:[#allocation8 + $0x8] sm:$0xff]  ;;  %v294_v4 = vmul.f32 %v2329_v1, %v2329_v1  ;;  %v296_v5 = vmul.f32 %v2331_v2, %v2331_v2  ;;  %v2339_v6 = vld [vmem:[#allocation8 + $0x18] sm:$0xff] }
  0x4b   :  { %1680 = vst.msk [vmem:[%s3367_s4 + $0x18] sm:$0xff] %vm3369_vm0, %v2075_v0  ;;  %1681 = vst.msk [vmem:[%s3367_s4 + $0x20] sm:$0xff] %vm3369_vm0, %v2075_v0  ;;  %v295_v7 = vmul.f32 %v2333_v3, %v2333_v3  ;;  %v297_v8 = vmul.f32 %v2339_v6, %v2339_v6  ;;  %v2345_v9 = vld [vmem:[#allocation8 + $0x28] sm:$0xff]  ;;  %v2347_v10 = vld [vmem:[#allocation8 + $0x20] sm:$0xff] }
  0x4c   :  { %1682 = vst.msk [vmem:[%s3367_s4 + $0x28] sm:$0xff] %vm3369_vm0, %v2075_v0  ;;  %1683 = vst.msk [vmem:[%s3367_s4 + $0x30] sm:$0xff] %vm3369_vm0, %v2075_v0  ;;  %310 = vadd.xlane.f32.xlu0 %v294_v4  ;;  %314 = vadd.xlane.f32.xlu1 %v296_v5  ;;  %v299_v11 = vmul.f32 %v2345_v9, %v2345_v9  ;;  %v298_v12 = vmul.f32 %v2347_v10, %v2347_v10  ;;  %v2353_v13 = vld [vmem:[#allocation8 + $0x38] sm:$0xff]  ;;  %v2355_v14 = vld [vmem:[#allocation8 + $0x30] sm:$0xff] }
  0x4d   :  { %1684 = vst.msk [vmem:[%s3367_s4 + $0x38] sm:$0xff] %vm3369_vm0, %v2075_v0  ;;  %1685 = vst.msk [vmem:[%s3367_s4 + $0x40] sm:$0xff] %vm3369_vm0, %v2075_v0  ;;  %v2357_v15 = vld [vmem:[#allocation8 + $0x48] sm:$0xff]  ;;  %v2359_v16 = vld [vmem:[#allocation8 + $0x40] sm:$0xff]  ;;  %v301_v17 = vmul.f32 %v2353_v13, %v2353_v13  ;;  %v300_v18 = vmul.f32 %v2355_v14, %v2355_v14 }
  0x4e   :  { %1686 = vst.msk [vmem:[%s3367_s4 + $0x48] sm:$0xff] %vm3369_vm0, %v2075_v0  ;;  %1687 = vst.msk [vmem:[%s3367_s4 + $0x50] sm:$0xff] %vm3369_vm0, %v2075_v0  ;;  %v2365_v19 = vld [vmem:[#allocation8 + $0x58] sm:$0xff]  ;;  %v2367_v20 = vld [vmem:[#allocation8 + $0x50] sm:$0xff]  ;;  %v303_v21 = vmul.f32 %v2357_v15, %v2357_v15  ;;  %v302_v22 = vmul.f32 %v2359_v16, %v2359_v16 }
  0x4f   :  { %1688 = vst.msk [vmem:[%s3367_s4 + $0x58] sm:$0xff] %vm3369_vm0, %v2075_v0  ;;  %1689 = vst.msk [vmem:[%s3367_s4 + $0x60] sm:$0xff] %vm3369_vm0, %v2075_v0  ;;  %v2373_v23 = vld [vmem:[#allocation8 + $0x68] sm:$0xff]  ;;  %v2375_v24 = vld [vmem:[#allocation8 + $0x60] sm:$0xff]  ;;  %v305_v25 = vmul.f32 %v2365_v19, %v2365_v19  ;;  %v304_v26 = vmul.f32 %v2367_v20, %v2367_v20 }
  0x50   :  { %1690 = vst.msk [vmem:[%s3367_s4 + $0x68] sm:$0xff] %vm3369_vm0, %v2075_v0  ;;  %1691 = vst.msk [vmem:[%s3367_s4 + $0x70] sm:$0xff] %vm3369_vm0, %v2075_v0  ;;  %312 = vadd.xlane.f32.xlu0 %v295_v7  ;;  %316 = vadd.xlane.f32.xlu1 %v297_v8  ;;  %v307_v27 = vmul.f32 %v2373_v23, %v2373_v23  ;;  %v306_v28 = vmul.f32 %v2375_v24, %v2375_v24  ;;  %v2385_v29 = vld [vmem:[#allocation8 + $0x78] sm:$0xff]  ;;  %v2387_v30 = vld [vmem:[#allocation8 + $0x70] sm:$0xff] }
  0x51   :  { %1692 = vst.msk [vmem:[%s3367_s4 + $0x78] sm:$0xff] %vm3369_vm0, %v2075_v0  ;;  %94 = vst.msk [vmem:[#allocation3] sm:$0xff] %vm3369_vm0, %v2075_v0  ;;  %v1825_v31 = vld [vmem:[#allocation11] sm:$0xff]   ;;  %v309_v32 = vmul.f32 %v2385_v29, %v2385_v29  ;;  %v308_v33 = vmul.f32 %v2387_v30, %v2387_v30  ;;  %v2393_v34 = vld [vmem:[#allocation6 + $0x8] sm:$0xff] }
  0x52   :  { %95 = vst.msk [vmem:[#allocation3 + $0x8] sm:$0xff] %vm3369_vm0, %v2075_v0  ;;  %96 = vst.msk [vmem:[#allocation3 + $0x10] sm:$0xff] %vm3369_vm0, %v2075_v0  ;;  %1780 = vmatprep.subr.bf16.mxu1 %v1825_v31  ;;  %v2395_v35 = vld [vmem:[#allocation6] sm:$0xff]  ;;  %v1826_v36 = vld [vmem:[#allocation11 + $0x8] sm:$0xff]   ;;  %v159_v37 = vmul.f32 %v2393_v34, %v2393_v34 }
  0x53   :  { %97 = vst.msk [vmem:[#allocation3 + $0x18] sm:$0xff] %vm3369_vm0, %v2075_v0  ;;  %98 = vst.msk [vmem:[#allocation3 + $0x20] sm:$0xff] %vm3369_vm0, %v2075_v0  ;;  %1781 = vmatpush3.bf16.xpose.msra.mxu1 %v1825_v31  ;;  %v158_v38 = vmul.f32 %v2395_v35, %v2395_v35  ;;  %v2401_v39 = vld [vmem:[#allocation6 + $0x18] sm:$0xff]  ;;  %v2403_v40 = vld [vmem:[#allocation6 + $0x10] sm:$0xff] }
  0x54   :  { %99 = vst.msk [vmem:[#allocation3 + $0x28] sm:$0xff] %vm3369_vm0, %v2075_v0  ;;  %100 = vst.msk [vmem:[#allocation3 + $0x30] sm:$0xff] %vm3369_vm0, %v2075_v0  ;;  %320 = vadd.xlane.f32.xlu1 %v299_v11  ;;  %318 = vadd.xlane.f32.xlu0 %v298_v12  ;;  %v161_v41 = vmul.f32 %v2401_v39, %v2401_v39  ;;  %v160_v42 = vmul.f32 %v2403_v40, %v2403_v40  ;;  %v2409_v43 = vld [vmem:[#allocation6 + $0x28] sm:$0xff]  ;;  %v2411_v44 = vld [vmem:[#allocation6 + $0x20] sm:$0xff] }
  0x55   :  { %101 = vst.msk [vmem:[#allocation3 + $0x38] sm:$0xff] %vm3369_vm0, %v2075_v0  ;;  %102 = vst.msk [vmem:[#allocation3 + $0x40] sm:$0xff] %vm3369_vm0, %v2075_v0  ;;  %1782 = vmatprep.subr.bf16.mxu1 %v1826_v36  ;;  %v163_v45 = vmul.f32 %v2409_v43, %v2409_v43  ;;  %v162_v46 = vmul.f32 %v2411_v44, %v2411_v44  ;;  %v2417_v47 = vld [vmem:[#allocation6 + $0x38] sm:$0xff]  ;;  %v2419_v48 = vld [vmem:[#allocation6 + $0x30] sm:$0xff] }
  0x56   :  { %103 = vst.msk [vmem:[#allocation3 + $0x48] sm:$0xff] %vm3369_vm0, %v2075_v0  ;;  %104 = vst.msk [vmem:[#allocation3 + $0x50] sm:$0xff] %vm3369_vm0, %v2075_v0  ;;  %v1827_v49 = vld [vmem:[#allocation11 + $0x10] sm:$0xff]   ;;  %v165_v50 = vmul.f32 %v2417_v47, %v2417_v47  ;;  %v164_v51 = vmul.f32 %v2419_v48, %v2419_v48  ;;  %v2425_v52 = vld [vmem:[#allocation6 + $0x48] sm:$0xff] }
  0x57   :  { %105 = vst.msk [vmem:[#allocation3 + $0x58] sm:$0xff] %vm3369_vm0, %v2075_v0  ;;  %106 = vst.msk [vmem:[#allocation3 + $0x60] sm:$0xff] %vm3369_vm0, %v2075_v0  ;;  %v2427_v53 = vld [vmem:[#allocation6 + $0x40] sm:$0xff]  ;;  %v167_v54 = vmul.f32 %v2425_v52, %v2425_v52  ;;  %v2433_v56 = vld [vmem:[#allocation6 + $0x58] sm:$0xff] }
  0x58   :  { %107 = vst.msk [vmem:[#allocation3 + $0x68] sm:$0xff] %vm3369_vm0, %v2075_v0  ;;  %108 = vst.msk [vmem:[#allocation3 + $0x70] sm:$0xff] %vm3369_vm0, %v2075_v0  ;;  %324 = vadd.xlane.f32.xlu1 %v301_v17  ;;  %322 = vadd.xlane.f32.xlu0 %v300_v18  ;;  %v166_v55 = vmul.f32 %v2427_v53, %v2427_v53  ;;  %v2435_v57 = vld [vmem:[#allocation6 + $0x50] sm:$0xff]  ;;  %v1828_v58 = vld [vmem:[#allocation11 + $0x18] sm:$0xff]   ;;  %v169_v59 = vmul.f32 %v2433_v56, %v2433_v56 }
  0x59   :  { %109 = vst.msk [vmem:[#allocation3 + $0x78] sm:$0xff] %vm3369_vm0, %v2075_v0  ;;  %110 = vst.msk [vmem:[#allocation4] sm:$0xff] %vm3369_vm0, %v2075_v0  ;;  %v168_v60 = vmul.f32 %v2435_v57, %v2435_v57  ;;  %v2441_v61 = vld [vmem:[#allocation6 + $0x68] sm:$0xff]  ;;  %v2443_v62 = vld [vmem:[#allocation6 + $0x60] sm:$0xff] }
  0x5a   :  { %111 = vst.msk [vmem:[#allocation4 + $0x8] sm:$0xff] %vm3369_vm0, %v2075_v0  ;;  %112 = vst.msk [vmem:[#allocation4 + $0x10] sm:$0xff] %vm3369_vm0, %v2075_v0  ;;  %v171_v63 = vmul.f32 %v2441_v61, %v2441_v61  ;;  %v170_v4 = vmul.f32 %v2443_v62, %v2443_v62  ;;  %v2449_v5 = vld [vmem:[#allocation6 + $0x78] sm:$0xff]  ;;  %v2451_v7 = vld [vmem:[#allocation6 + $0x70] sm:$0xff] }
  0x5b   :  { %113 = vst.msk [vmem:[#allocation4 + $0x18] sm:$0xff] %vm3369_vm0, %v2075_v0  ;;  %114 = vst.msk [vmem:[#allocation4 + $0x20] sm:$0xff] %vm3369_vm0, %v2075_v0  ;;  %1783 = vmatpush3.bf16.xpose.msra.mxu1 %v1826_v36  ;;  %v1829_v8 = vld [vmem:[#allocation11 + $0x20] sm:$0xff]   ;;  %v173_v11 = vmul.f32 %v2449_v5, %v2449_v5  ;;  %v172_v12 = vmul.f32 %v2451_v7, %v2451_v7  ;;  %v1830_v17 = vld [vmem:[#allocation11 + $0x28] sm:$0xff]  }
  0x5c   :  { %115 = vst.msk [vmem:[#allocation4 + $0x28] sm:$0xff] %vm3369_vm0, %v2075_v0  ;;  %116 = vst.msk [vmem:[#allocation4 + $0x30] sm:$0xff] %vm3369_vm0, %v2075_v0  ;;  %328 = vadd.xlane.f32.xlu1 %v303_v21  ;;  %326 = vadd.xlane.f32.xlu0 %v302_v22  ;;  %v1831_v18 = vld [vmem:[#allocation11 + $0x30] sm:$0xff]   ;;  %v1832_v21 = vld [vmem:[#allocation11 + $0x38] sm:$0xff]  }
  0x5d   :  { %117 = vst.msk [vmem:[#allocation4 + $0x38] sm:$0xff] %vm3369_vm0, %v2075_v0  ;;  %118 = vst.msk [vmem:[#allocation4 + $0x40] sm:$0xff] %vm3369_vm0, %v2075_v0  ;;  %1784 = vmatprep.subr.bf16.mxu1 %v1827_v49  ;;  %v1833_v22 = vld [vmem:[#allocation10] sm:$0xff]   ;;  %v1838_v31 = vld [vmem:[#allocation10 + $0x28] sm:$0xff]  }
  0x5e   :  { %119 = vst.msk [vmem:[#allocation4 + $0x48] sm:$0xff] %vm3369_vm0, %v2075_v0  ;;  %120 = vst.msk [vmem:[#allocation4 + $0x50] sm:$0xff] %vm3369_vm0, %v2075_v0  ;;  %1796 = vmatprep.mubr.bf16.mxu1 %v1833_v22 }
  0x5f   :  { %121 = vst.msk [vmem:[#allocation4 + $0x58] sm:$0xff] %vm3369_vm0, %v2075_v0  ;;  %122 = vst.msk [vmem:[#allocation4 + $0x60] sm:$0xff] %vm3369_vm0, %v2075_v0 }
  0x60   :  { %123 = vst.msk [vmem:[#allocation4 + $0x68] sm:$0xff] %vm3369_vm0, %v2075_v0  ;;  %124 = vst.msk [vmem:[#allocation4 + $0x70] sm:$0xff] %vm3369_vm0, %v2075_v0  ;;  %332 = vadd.xlane.f32.xlu1 %v305_v25  ;;  %330 = vadd.xlane.f32.xlu0 %v304_v26  ;;  %v1834_v25 = vld [vmem:[#allocation10 + $0x8] sm:$0xff]   ;;  %v1835_v26 = vld [vmem:[#allocation10 + $0x10] sm:$0xff]  }
  0x61   :  { %125 = vst.msk [vmem:[#allocation4 + $0x78] sm:$0xff] %vm3369_vm0, %v2075_v0  ;;  %126 = vst.msk [vmem:[#allocation5] sm:$0xff] %vm3369_vm0, %v2075_v0 }
  0x62   :  { %127 = vst.msk [vmem:[#allocation5 + $0x8] sm:$0xff] %vm3369_vm0, %v2075_v0  ;;  %128 = vst.msk [vmem:[#allocation5 + $0x10] sm:$0xff] %vm3369_vm0, %v2075_v0 }
  0x63   :  { %129 = vst.msk [vmem:[#allocation5 + $0x18] sm:$0xff] %vm3369_vm0, %v2075_v0  ;;  %130 = vst.msk [vmem:[#allocation5 + $0x20] sm:$0xff] %vm3369_vm0, %v2075_v0  ;;  %1785 = vmatpush3.bf16.xpose.msra.mxu1 %v1827_v49 }
  0x64   :  { %131 = vst.msk [vmem:[#allocation5 + $0x28] sm:$0xff] %vm3369_vm0, %v2075_v0  ;;  %132 = vst.msk [vmem:[#allocation5 + $0x30] sm:$0xff] %vm3369_vm0, %v2075_v0  ;;  %336 = vadd.xlane.f32.xlu1 %v307_v27  ;;  %334 = vadd.xlane.f32.xlu0 %v306_v28  ;;  %v1836_v27 = vld [vmem:[#allocation10 + $0x18] sm:$0xff]   ;;  %v1837_v28 = vld [vmem:[#allocation10 + $0x20] sm:$0xff]  }
  0x65   :  { %133 = vst.msk [vmem:[#allocation5 + $0x38] sm:$0xff] %vm3369_vm0, %v2075_v0  ;;  %134 = vst.msk [vmem:[#allocation5 + $0x40] sm:$0xff] %vm3369_vm0, %v2075_v0  ;;  %1786 = vmatprep.subr.bf16.mxu1 %v1828_v58 }
  0x66   :  { %135 = vst.msk [vmem:[#allocation5 + $0x48] sm:$0xff] %vm3369_vm0, %v2075_v0  ;;  %136 = vst.msk [vmem:[#allocation5 + $0x50] sm:$0xff] %vm3369_vm0, %v2075_v0 }
  0x67   :  { %137 = vst.msk [vmem:[#allocation5 + $0x58] sm:$0xff] %vm3369_vm0, %v2075_v0  ;;  %138 = vst.msk [vmem:[#allocation5 + $0x60] sm:$0xff] %vm3369_vm0, %v2075_v0 }
  0x68   :  { %139 = vst.msk [vmem:[#allocation5 + $0x68] sm:$0xff] %vm3369_vm0, %v2075_v0  ;;  %140 = vst.msk [vmem:[#allocation5 + $0x70] sm:$0xff] %vm3369_vm0, %v2075_v0  ;;  %340 = vadd.xlane.f32.xlu1 %v309_v32  ;;  %338 = vadd.xlane.f32.xlu0 %v308_v33  ;;  %v1839_v32 = vld [vmem:[#allocation10 + $0x30] sm:$0xff]   ;;  %v1840_v33 = vld [vmem:[#allocation10 + $0x38] sm:$0xff]  }
  0x69   :  { %141 = vst.msk [vmem:[#allocation5 + $0x78] sm:$0xff] %vm3369_vm0, %v2075_v0 }
  0x6b   :  { %1787 = vmatpush3.bf16.xpose.msra.mxu1 %v1828_v58 }
  0x6c   :  { %176 = vadd.xlane.f32.xlu1 %v159_v37  ;;  %174 = vadd.xlane.f32.xlu0 %v158_v38 }
  0x6d   :  { %1788 = vmatprep.subr.bf16.mxu1 %v1829_v8 }
  0x70   :  { %180 = vadd.xlane.f32.xlu1 %v161_v41  ;;  %178 = vadd.xlane.f32.xlu0 %v160_v42 }
  0x73   :  { %1789 = vmatpush3.bf16.xpose.msra.mxu1 %v1829_v8 }
  0x74   :  { %184 = vadd.xlane.f32.xlu1 %v163_v45  ;;  %182 = vadd.xlane.f32.xlu0 %v162_v46 }
  0x75   :  { %1790 = vmatprep.subr.bf16.mxu1 %v1830_v17 }
  0x78   :  { %188 = vadd.xlane.f32.xlu1 %v165_v50  ;;  %186 = vadd.xlane.f32.xlu0 %v164_v51 }
  0x7b   :  { %1791 = vmatpush3.bf16.xpose.msra.mxu1 %v1830_v17 }
  0x7c   :  { %192 = vadd.xlane.f32.xlu1 %v167_v54  ;;  %190 = vadd.xlane.f32.xlu0 %v166_v55 }
  0x7d   :  { %1792 = vmatprep.subr.bf16.mxu1 %v1831_v18 }
  0x80   :  { %196 = vadd.xlane.f32.xlu1 %v169_v59  ;;  %194 = vadd.xlane.f32.xlu0 %v168_v60 }
  0x83   :  { %1793 = vmatpush3.bf16.xpose.msra.mxu1 %v1831_v18 }
  0x84   :  { %200 = vadd.xlane.f32.xlu1 %v171_v63  ;;  %198 = vadd.xlane.f32.xlu0 %v170_v4 }
  0x85   :  { %1794 = vmatprep.subr.bf16.mxu1 %v1832_v21 }
  0x88   :  { %204 = vadd.xlane.f32.xlu1 %v173_v11  ;;  %202 = vadd.xlane.f32.xlu0 %v172_v12 }
  0x8b   :  { %1795 = vmatpush3.bf16.xpose.msra.mxu1 %v1832_v21 }
  0x92   :  { %1797 = vmatmul.mubr.bf16.vlgmr.msra.gmra.mrb[0].mxu1 %v1834_v25 }
  0x93   :  { %1800 = vmatprep.mubr.bf16.mxu1 %v1835_v26 }
  0x9a   :  { %1801 = vmatmul.mubr.bf16.gmra.mrb[4].mxu1 %v1836_v27 }
  0x9b   :  { %1804 = vmatprep.mubr.bf16.mxu1 %v1837_v28 }
  0xa2   :  { %1805 = vmatmul.mubr.bf16.gmra.mrb[8].mxu1 %v1838_v31 }
  0xa3   :  { %1808 = vmatprep.mubr.bf16.mxu1 %v1839_v32 }
  0xaa   :  { %1809 = vmatmul.mubr.bf16.gmra.mrb[12].mxu1 %v1840_v33 }
  0xd9   :  { %v311_v36 = vpop.xlane.xlu0 %310  ;;  %v315_v37 = vpop.xlane.xlu1 %314 }
  0xda   :  { %v342_v38 = vmax.f32 %v311_v36, 1e-16  ;;  %v344_v41 = vmax.f32 %v315_v37, 1e-16 }
  0xdc   :  { %1841 = vrsqrt.f32 %v342_v38 }
  0xdd   :  { %1843 = vrsqrt.f32 %v344_v41  ;;  %v313_v42 = vpop.xlane.xlu0 %312  ;;  %v317_v45 = vpop.xlane.xlu1 %316 }
  0xde   :  { %v343_v46 = vmax.f32 %v313_v42, 1e-16  ;;  %v345_v49 = vmax.f32 %v317_v45, 1e-16 }
  0xe0   :  { %1845 = vrsqrt.f32 %v343_v46 }
  0xe1   :  { %1847 = vrsqrt.f32 %v345_v49  ;;  %v321_v50 = vpop.xlane.xlu1 %320  ;;  %v319_v51 = vpop.xlane.xlu0 %318 }
  0xe2   :  { %v347_v54 = vmax.f32 %v321_v50, 1e-16  ;;  %v346_v55 = vmax.f32 %v319_v51, 1e-16 }
  0xe4   :  { %1849 = vrsqrt.f32 %v347_v54 }
  0xe5   :  { %1851 = vrsqrt.f32 %v346_v55  ;;  %v325_v58 = vpop.xlane.xlu1 %324  ;;  %v323_v59 = vpop.xlane.xlu0 %322 }
  0xe6   :  { %v1842_v60 = vpop.eup %1841  ;;  %v349_v63 = vmax.f32 %v325_v58, 1e-16  ;;  %v348_v4 = vmax.f32 %v323_v59, 1e-16 }
  0xe7   :  { %v1844_v8 = vpop.eup %1843  ;;  %v374_v12 = vmul.f32 %v1842_v60, %v2329_v1 }
  0xe8   :  { %v376_v11 = vmul.f32 %v1844_v8, %v2331_v2  ;;  %1853 = vrsqrt.f32 %v349_v63 }
  0xe9   :  { %v329_v17 = vpop.xlane.xlu1 %328  ;;  %v327_v18 = vpop.xlane.xlu0 %326  ;;  %1855 = vrsqrt.f32 %v348_v4  ;;  %v390_v28 = vmul.f32 0.70710677, %v374_v12 }
  0xea   :  { %v1846_v21 = vpop.eup %1845  ;;  %v392_v27 = vmul.f32 0.70710677, %v376_v11  ;;  %v351_v32 = vmax.f32 %v329_v17, 1e-16  ;;  %v350_v38 = vmax.f32 %v327_v18, 1e-16 }
  0xeb   :  { %v1848_v22 = vpop.eup %1847  ;;  %v375_v25 = vmul.f32 %v1846_v21, %v2333_v3 }
  0xec   :  { %v377_v26 = vmul.f32 %v1848_v22, %v2339_v6  ;;  %1857 = vrsqrt.f32 %v351_v32 }
  0xed   :  { %v391_v31 = vmul.f32 0.70710677, %v375_v25  ;;  %v333_v33 = vpop.xlane.xlu1 %332  ;;  %v331_v36 = vpop.xlane.xlu0 %330  ;;  %1859 = vrsqrt.f32 %v350_v38 }
  0xee   :  { %v1850_v37 = vpop.eup %1849  ;;  %v393_v2 = vmul.f32 0.70710677, %v377_v26  ;;  %v353_v55 = vmax.f32 %v333_v33, 1e-16  ;;  %v352_v60 = vmax.f32 %v331_v36, 1e-16 }
  0xef   :  { %v1852_v1 = vpop.eup %1851  ;;  %v406_v41 = vpack.c.bf16 %v391_v31, %v390_v28  ;;  %v379_v42 = vmul.f32 %v1850_v37, %v2345_v9 }
  0xf0   :  { %v407_v45 = vpack.c.bf16 %v393_v2, %v392_v27  ;;  %v378_v46 = vmul.f32 %v1852_v1, %v2347_v10  ;;  %1861 = vrsqrt.f32 %v353_v55 }
  0xf1   :  { %1748 = vmatprep.subr.bf16.mxu0 %v406_v41  ;;  %v337_v3 = vpop.xlane.xlu1 %336  ;;  %v335_v6 = vpop.xlane.xlu0 %334  ;;  %v395_v51 = vmul.f32 0.70710677, %v379_v42  ;;  %1863 = vrsqrt.f32 %v352_v60 }
  0xf2   :  { %1749 = vmatpush3.bf16.xpose.msra.mxu0 %v406_v41  ;;  %v1854_v49 = vpop.eup %1853  ;;  %v394_v50 = vmul.f32 0.70710677, %v378_v46  ;;  %v355_v25 = vmax.f32 %v337_v3, 1e-16  ;;  %v354_v26 = vmax.f32 %v335_v6, 1e-16 }
  0xf3   :  { %1750 = vmatprep.subr.bf16.mxu0 %v407_v45  ;;  %v1856_v54 = vpop.eup %1855  ;;  %v381_v10 = vmul.f32 %v1854_v49, %v2353_v13 }
  0xf4   :  { %v408_v63 = vpack.c.bf16 %v395_v51, %v394_v50  ;;  %v380_v9 = vmul.f32 %v1856_v54, %v2355_v14 }
  0xf5   :  { %v341_v58 = vpop.xlane.xlu1 %340  ;;  %v339_v59 = vpop.xlane.xlu0 %338  ;;  %v397_v21 = vmul.f32 0.70710677, %v381_v10 }
  0xf6   :  { %v1858_v17 = vpop.eup %1857  ;;  %v396_v18 = vmul.f32 0.70710677, %v380_v9  ;;  %v357_v36 = vmax.f32 %v341_v58, 1e-16  ;;  %v356_v2 = vmax.f32 %v339_v59, 1e-16 }
  0xf7   :  { %v1860_v22 = vpop.eup %1859  ;;  %v383_v13 = vmul.f32 %v1858_v17, %v2357_v15 }
  0xf8   :  { %v409_v27 = vpack.c.bf16 %v397_v21, %v396_v18  ;;  %v382_v14 = vmul.f32 %v1860_v22, %v2359_v16 }
  0xf9   :  { %v177_v4 = vpop.xlane.xlu1 %176  ;;  %v175_v8 = vpop.xlane.xlu0 %174  ;;  %v399_v32 = vmul.f32 0.70710677, %v383_v13 }
  0xfa   :  { %1751 = vmatpush3.bf16.xpose.msra.mxu0 %v407_v45  ;;  %v207_v11 = vmax.f32 %v177_v4, 1e-16  ;;  %v206_v12 = vmax.f32 %v175_v8, 1e-16  ;;  %v1862_v28 = vpop.eup %1861  ;;  %v398_v31 = vmul.f32 0.70710677, %v382_v14 }
  0xfb   :  { %1752 = vmatprep.subr.bf16.mxu0 %v408_v63  ;;  %v1864_v33 = vpop.eup %1863  ;;  %v385_v42 = vmul.f32 %v1862_v28, %v2365_v19 }
  0xfc   :  { %1865 = vrsqrt.f32 %v207_v11  ;;  %v410_v1 = vpack.c.bf16 %v399_v32, %v398_v31  ;;  %v384_v41 = vmul.f32 %v1864_v33, %v2367_v20 }
  0xfd   :  { %1867 = vrsqrt.f32 %v206_v12  ;;  %v181_v46 = vpop.xlane.xlu1 %180  ;;  %v401_v50 = vmul.f32 0.70710677, %v385_v42  ;;  %v179_v51 = vpop.xlane.xlu0 %178 }
  0xfe   :  { %1869 = vrsqrt.f32 %v355_v25  ;;  %v400_v49 = vmul.f32 0.70710677, %v384_v41  ;;  %v209_v59 = vmax.f32 %v181_v46, 1e-16 }
  0xff   :  { %1871 = vrsqrt.f32 %v354_v26 }
 0x100   :  { %1873 = vrsqrt.f32 %v357_v36  ;;  %v411_v19 = vpack.c.bf16 %v401_v50, %v400_v49 }
 0x101   :  { %1875 = vrsqrt.f32 %v356_v2  ;;  %v185_v20 = vpop.xlane.xlu1 %184  ;;  %v183_v58 = vpop.xlane.xlu0 %182 }
 0x102   :  { %1753 = vmatpush3.bf16.xpose.msra.mxu0 %v408_v63  ;;  %v208_v63 = vmax.f32 %v179_v51, 1e-16  ;;  %v211_v8 = vmax.f32 %v185_v20, 1e-16  ;;  %v210_v12 = vmax.f32 %v183_v58, 1e-16  ;;  %1877 = vrsqrt.f32 %v209_v59 }
 0x103   :  { %1754 = vmatprep.subr.bf16.mxu0 %v409_v27 }
 0x104   :  { %1879 = vrsqrt.f32 %v208_v63 }
 0x105   :  { %v189_v11 = vpop.xlane.xlu1 %188  ;;  %v187_v17 = vpop.xlane.xlu0 %186  ;;  %1881 = vrsqrt.f32 %v211_v8 }
 0x106   :  { %v1866_v37 = vpop.eup %1865  ;;  %1883 = vrsqrt.f32 %v210_v12  ;;  %v213_v25 = vmax.f32 %v189_v11, 1e-16  ;;  %v212_v14 = vmax.f32 %v187_v17, 1e-16 }
 0x107   :  { %v1868_v38 = vpop.eup %1867  ;;  %v239_v16 = vmul.f32 %v1866_v37, %v2393_v34 }
 0x108   :  { %v238_v15 = vmul.f32 %v1868_v38, %v2395_v35  ;;  %v1870_v6 = vpop.eup %1869  ;;  %1885 = vrsqrt.f32 %v213_v25 }
 0x109   :  { %v255_v45 = vmul.f32 0.70710677, %v239_v16  ;;  %v1872_v54 = vpop.eup %1871  ;;  %v387_v35 = vmul.f32 %v1870_v6, %v2373_v23  ;;  %v193_v21 = vpop.xlane.xlu1 %192  ;;  %1887 = vrsqrt.f32 %v212_v14 }
 0x10a   :  { %1755 = vmatpush3.bf16.xpose.msra.mxu0 %v409_v27  ;;  %v254_v3 = vmul.f32 0.70710677, %v238_v15  ;;  %v386_v34 = vmul.f32 %v1872_v54, %v2375_v24  ;;  %v1874_v60 = vpop.eup %1873  ;;  %v191_v22 = vpop.xlane.xlu0 %190  ;;  %v215_v13 = vmax.f32 %v193_v21, 1e-16 }
 0x10b   :  { %1756 = vmatprep.subr.bf16.mxu0 %v410_v1  ;;  %v403_v10 = vmul.f32 0.70710677, %v387_v35  ;;  %v1876_v4 = vpop.eup %1875  ;;  %v389_v23 = vmul.f32 %v1874_v60, %v2385_v29  ;;  %v214_v28 = vmax.f32 %v191_v22, 1e-16 }
 0x10c   :  { %v270_v55 = vpack.c.bf16 %v255_v45, %v254_v3  ;;  %v402_v9 = vmul.f32 0.70710677, %v386_v34  ;;  %v388_v24 = vmul.f32 %v1876_v4, %v2387_v30  ;;  %v1878_v30 = vpop.eup %1877  ;;  %1889 = vrsqrt.f32 %v215_v13 }
 0x10d   :  { %v405_v27 = vmul.f32 0.70710677, %v389_v23  ;;  %v197_v31 = vpop.xlane.xlu1 %196  ;;  %1891 = vrsqrt.f32 %v214_v28  ;;  %v241_v15 = vmul.f32 %v1878_v30, %v2401_v39 }
 0x10e   :  { %1764 = vmatprep.mubr.bf16.mxu0 %v270_v55  ;;  %v412_v18 = vpack.c.bf16 %v403_v10, %v402_v9  ;;  %v404_v26 = vmul.f32 0.70710677, %v388_v24  ;;  %v195_v33 = vpop.xlane.xlu0 %194  ;;  %v1880_v29 = vpop.eup %1879  ;;  %v217_v37 = vmax.f32 %v197_v31, 1e-16 }
 0x10f   :  { %v1882_v36 = vpop.eup %1881  ;;  %v240_v16 = vmul.f32 %v1880_v29, %v2403_v40  ;;  %v257_v54 = vmul.f32 0.70710677, %v241_v15 }
 0x110   :  { %v413_v32 = vpack.c.bf16 %v405_v27, %v404_v26  ;;  %v1884_v38 = vpop.eup %1883  ;;  %1893 = vrsqrt.f32 %v217_v37  ;;  %v243_v3 = vmul.f32 %v1882_v36, %v2409_v43 }
 0x111   :  { %v201_v2 = vpop.xlane.xlu1 %200  ;;  %v242_v46 = vmul.f32 %v1884_v38, %v2411_v44  ;;  %v256_v51 = vmul.f32 0.70710677, %v240_v16 }
 0x112   :  { %1757 = vmatpush3.bf16.xpose.msra.mxu0 %v410_v1  ;;  %v216_v1 = vmax.f32 %v195_v33, 1e-16  ;;  %v199_v41 = vpop.xlane.xlu0 %198  ;;  %v219_v42 = vmax.f32 %v201_v2, 1e-16  ;;  %v1886_v6 = vpop.eup %1885 }
 0x113   :  { %1758 = vmatprep.subr.bf16.mxu0 %v411_v19  ;;  %v218_v45 = vmax.f32 %v199_v41, 1e-16  ;;  %v1888_v50 = vpop.eup %1887  ;;  %v258_v40 = vmul.f32 0.70710677, %v242_v46  ;;  %v271_v58 = vpack.c.bf16 %v257_v54, %v256_v51  ;;  %v245_v43 = vmul.f32 %v1886_v6, %v2417_v47 }
 0x114   :  { %1895 = vrsqrt.f32 %v216_v1  ;;  %v244_v44 = vmul.f32 %v1888_v50, %v2419_v48  ;;  %v2076_v50 = vmov -1e+30  }
 0x115   :  { %1897 = vrsqrt.f32 %v219_v42  ;;  %v205_v49 = vpop.xlane.xlu1 %204  ;;  %v261_v8 = vmul.f32 0.70710677, %v245_v43  ;;  %80 = vst.msk [vmem:[#allocation2 + $0x10] sm:$0xff] %vm3369_vm0, %v2076_v50  ;;  %78 = vst.msk [vmem:[#allocation2] sm:$0xff] %vm3369_vm0, %v2076_v50 }
 0x116   :  { %1899 = vrsqrt.f32 %v218_v45  ;;  %v203_v55 = vpop.xlane.xlu0 %202  ;;  %v1890_v20 = vpop.eup %1889  ;;  %v221_v34 = vmax.f32 %v205_v49, 1e-16  ;;  %v260_v4 = vmul.f32 0.70710677, %v244_v44  ;;  %79 = vst.msk [vmem:[#allocation2 + $0x8] sm:$0xff] %vm3369_vm0, %v2076_v50  ;;  %81 = vst.msk [vmem:[#allocation2 + $0x18] sm:$0xff] %vm3369_vm0, %v2076_v50 }
 0x117   :  { %v1892_v39 = vpop.eup %1891  ;;  %v220_v35 = vmax.f32 %v203_v55, 1e-16  ;;  %v247_v63 = vmul.f32 %v1890_v20, %v2425_v52  ;;  %82 = vst.msk [vmem:[#allocation2 + $0x20] sm:$0xff] %vm3369_vm0, %v2076_v50  ;;  %83 = vst.msk [vmem:[#allocation2 + $0x28] sm:$0xff] %vm3369_vm0, %v2076_v50 }
 0x118   :  { %v246_v60 = vmul.f32 %v1892_v39, %v2427_v53  ;;  %1901 = vrsqrt.f32 %v221_v34  ;;  %v273_v48 = vpack.c.bf16 %v261_v8, %v260_v4  ;;  %84 = vst.msk [vmem:[#allocation2 + $0x30] sm:$0xff] %vm3369_vm0, %v2076_v50  ;;  %85 = vst.msk [vmem:[#allocation2 + $0x38] sm:$0xff] %vm3369_vm0, %v2076_v50 }
 0x119   :  { %1903 = vrsqrt.f32 %v220_v35  ;;  %v263_v17 = vmul.f32 0.70710677, %v247_v63  ;;  %86 = vst.msk [vmem:[#allocation2 + $0x40] sm:$0xff] %vm3369_vm0, %v2076_v50  ;;  %87 = vst.msk [vmem:[#allocation2 + $0x48] sm:$0xff] %vm3369_vm0, %v2076_v50 }
 0x11a   :  { %1759 = vmatpush3.bf16.xpose.msra.mxu0 %v411_v19  ;;  %v259_v19 = vmul.f32 0.70710677, %v243_v3  ;;  %v1894_v9 = vpop.eup %1893  ;;  %v262_v12 = vmul.f32 0.70710677, %v246_v60  ;;  %88 = vst.msk [vmem:[#allocation2 + $0x50] sm:$0xff] %vm3369_vm0, %v2076_v50  ;;  %89 = vst.msk [vmem:[#allocation2 + $0x58] sm:$0xff] %vm3369_vm0, %v2076_v50 }
 0x11b   :  { %1760 = vmatprep.subr.bf16.mxu0 %v412_v18  ;;  %v249_v24 = vmul.f32 %v1894_v9, %v2433_v56  ;;  %90 = vst.msk [vmem:[#allocation2 + $0x60] sm:$0xff] %vm3369_vm0, %v2076_v50  ;;  %91 = vst.msk [vmem:[#allocation2 + $0x68] sm:$0xff] %vm3369_vm0, %v2076_v50 }
 0x11c   :  { %v272_v59 = vpack.c.bf16 %v259_v19, %v258_v40  ;;  %v274_v53 = vpack.c.bf16 %v263_v17, %v262_v12  ;;  %92 = vst.msk [vmem:[#allocation2 + $0x70] sm:$0xff] %vm3369_vm0, %v2076_v50  ;;  %93 = vst.msk [vmem:[#allocation2 + $0x78] sm:$0xff] %vm3369_vm0, %v2076_v50  ;;  %v3434_v12 = vmov 0 }
 0x11d   :  { %v265_v25 = vmul.f32 0.70710677, %v249_v24 }
 0x11e   :  { %v1896_v10 = vpop.eup %1895 }
 0x11f   :  { %v1898_v11 = vpop.eup %1897  ;;  %v248_v47 = vmul.f32 %v1896_v10, %v2435_v57  ;;  %v3071_v10 = vld [vmem:[#allocation2 + $0x30] sm:$0xff] }
 0x120   :  { %v251_v23 = vmul.f32 %v1898_v11, %v2441_v61  ;;  %v736_v61 = vlaneseq  ;;  %v1245_v11 = vld [vmem:[#allocation4 + $0x18] sm:$0xff]  ;;  %3489 = vst [vmem:[#allocation24_spill] sm:$0xff] %v3071_v10 }
 0x121   :  { %v264_v22 = vmul.f32 0.70710677, %v248_v47 }
 0x122   :  { %1761 = vmatpush3.bf16.xpose.msra.mxu0 %v412_v18  ;;  %v1900_v18 = vpop.eup %1899  ;;  %v267_v14 = vmul.f32 0.70710677, %v251_v23  ;;  %v2489_v33 = vshrl.u32 %v736_v61, 7  ;;  %v2491_v30 = vand.u32 127, %v736_v61 }
 0x123   :  { %1762 = vmatprep.subr.bf16.mxu0 %v413_v32  ;;  %v250_v52 = vmul.f32 %v1900_v18, %v2443_v62  ;;  %v1902_v21 = vpop.eup %1901  ;;  %v275_v13 = vpack.c.bf16 %v265_v25, %v264_v22  ;;  %v1338_v18 = vld [vmem:[#allocation5] sm:$0xff] }
 0x124   :  { %v1904_v26 = vpop.eup %1903  ;;  %v253_v57 = vmul.f32 %v1902_v21, %v2449_v5  ;;  %vm776_vm1 = vcmp.ne.s32.totalorder %v2489_v33, %v2491_v30  ;;  %v739_v51 = vadd.s32 16, %v2489_v33  ;;  %v740_v54 = vadd.s32 24, %v2489_v33 }
 0x125   :  { %v266_v27 = vmul.f32 0.70710677, %v250_v52  ;;  %v252_v28 = vmul.f32 %v1904_v26, %v2451_v7  ;;  %vm3377_vm6 = vcmp.lt.s32.totalorder %v2491_v30, 8  ;;  %v738_v55 = vadd.s32 8, %v2489_v33 }
 0x126   :  { %vm778_vm4 = vcmp.ne.s32.totalorder %v739_v51, %v2491_v30  ;;  %v743_v20 = vadd.s32 48, %v2489_v33  ;;  %vm779_vm9 = vcmp.ne.s32.totalorder %v740_v54, %v2491_v30  ;;  %vm2564_vm10 = vmand %vm776_vm1, %vm3377_vm6  ;;  %v741_v9 = vadd.s32 32, %v2489_v33 }
 0x127   :  { %v276_v31 = vpack.c.bf16 %v267_v14, %v266_v27  ;;  %v268_v56 = vmul.f32 0.70710677, %v252_v28  ;;  %vm2554_vm8 = vmand %vm778_vm4, %vm3377_vm6  ;;  %vm777_vm11 = vcmp.ne.s32.totalorder %v738_v55, %v2491_v30  ;;  %v2612_v8 = vadd.s32 56, %v2489_v33 }
 0x128   :  { %vm2578_vm12 = vmand %vm779_vm9, %vm3377_vm6  ;;  %vm782_vm15 = vcmp.ne.s32.totalorder %v743_v20, %v2491_v30  ;;  %v2626_v17 = vadd.s32 40, %v2489_v33  ;;  %v3421_v21 = vmov 0  ;;  %v3423_v27 = vmov 0 }
 0x129   :  { %vm2597_vm14 = vmand %vm777_vm11, %vm3377_vm6  ;;  %v2735_v50 = vadd.s32 72, %v2489_v33  ;;  %v3432_v20 = vmov 0  ;;  %v2814_v61 = vadd.s32 104, %v2489_v33  ;;  %v3456_v51 = vmov 0 }
 0x12a   :  { %1763 = vmatpush3.bf16.xpose.msra.mxu0 %v413_v32  ;;  %v269_v32 = vmul.f32 0.70710677, %v253_v57  ;;  %v3425_v57 = vmov 0 }
 0x12c   :  { %v277_v62 = vpack.c.bf16 %v269_v32, %v268_v56  ;;  %v2700_v32 = vadd.s32 64, %v2489_v33 }
 0x131   :  { %1765 = vmatmul.mubr.bf16.vlgmr.msra.gmra.mrb[0].mxu0 %v271_v58 }
 0x132   :  { %1768 = vmatprep.mubr.bf16.mxu0 %v272_v59 }
 0x139   :  { %1769 = vmatmul.mubr.bf16.gmra.mrb[4].mxu0 %v273_v48 }
 0x13a   :  { %1772 = vmatprep.mubr.bf16.mxu0 %v274_v53 }
 0x141   :  { %1773 = vmatmul.mubr.bf16.gmra.mrb[8].mxu0 %v275_v13  ;;  %v747_v13 = vadd.s32 80, %v2489_v33 }
 0x142   :  { %1776 = vmatprep.mubr.bf16.mxu0 %v276_v31 }
 0x149   :  { %1777 = vmatmul.mubr.bf16.gmra.mrb[12].mxu0 %v277_v62 }
 0x165   :  { %v1798_v29 = vpop.f32.mrb[0].mxu1 }
 0x166   :  { %v673_v36 = vpop.f32.mrb[1].mxu1  ;;  %vm1196_vm5 = vcmp.gt.f32.partialorder %v1798_v29, 0.5 }
 0x167   :  { %vm1194_vm2 = vcmp.gt.f32.partialorder %v673_v36, 0.5  ;;  %v2495_v7 = vpop.f32.mrb[2].mxu1  ;;  %vm1212_vm7 = vmand %vm1196_vm5, %vm778_vm4  ;;  %vm3368_vm4 = vcmp.ne.s32.totalorder %v741_v9, %v2491_v30 }
 0x168   :  { %v2497_v5 = vpop.f32.mrb[3].mxu1  ;;  %vm1210_vm3 = vmand %vm1194_vm2, %vm776_vm1  ;;  %v2572_v34 = vsel %vm1212_vm7, 1.0, %v2075_v0  ;;  %vm1197_vm13 = vcmp.gt.f32.partialorder %v2495_v7, 0.5  ;;  %vm3371_vm7 = vcmp.ne.s32.totalorder %v2612_v8, %v2491_v30 }
 0x169   :  { %v2503_v37 = vsel %vm1210_vm3, 1.0, %v2075_v0  ;;  %vm2621_vm2 = vmand %vm1197_vm13, %vm779_vm9  ;;  %vm1195_vm13 = vcmp.gt.f32.partialorder %v2497_v5, 0.5 }
 0x16a   :  { %1354 = vadd.xlane.f32.xlu0 %v2503_v37  ;;  %vm2644_vm5 = vmand %vm782_vm15, %vm3377_vm6  ;;  %v2716_v29 = vsel %vm2621_vm2, 1.0, %v2075_v0 }
 0x16b   :  { %vm2654_vm9 = vmand %vm3368_vm4, %vm3377_vm6 }
 0x16c   :  { %v3422_v21 = vsel %vm2654_vm9, 4294967295, %v3421_v21 }
 0x16d   :  { %v2506_v2 = vpop.f32.mrb[4].mxu1 }
 0x16e   :  { %v2508_v38 = vpop.f32.mrb[5].mxu1  ;;  %vm1200_vm1 = vcmp.gt.f32.partialorder %v2506_v2, 0.5 }
 0x16f   :  { %v2510_v1 = vpop.f32.mrb[6].mxu1  ;;  %vm1216_vm3 = vmand %vm1200_vm1, %vm782_vm15  ;;  %vm3370_vm15 = vcmp.ne.s32.totalorder %v2626_v17, %v2491_v30  ;;  %vm1198_vm4 = vcmp.gt.f32.partialorder %v2508_v38, 0.5  ;;  %v3430_v38 = vmov 0 }
 0x170   :  { %v2512_v41 = vpop.f32.mrb[7].mxu1  ;;  %v2664_v26 = vsel %vm1216_vm3, 1.0, %v2075_v0  ;;  %vm2673_vm1 = vmand %vm3371_vm7, %vm3377_vm6 }
 0x171   :  { %v3424_v27 = vsel %vm2673_vm1, 4294967295, %v3423_v27  ;;  %vm2690_vm3 = vmand %vm3370_vm15, %vm3377_vm6  ;;  %vm3373_vm15 = vcmp.ne.s32.totalorder %v2700_v32, %v2491_v30 }
 0x172   :  { %v3426_v57 = vsel %vm2690_vm3, 4294967295, %v3425_v57 }
 0x175   :  { %v2514_v42 = vpop.f32.mrb[8].mxu1 }
 0x176   :  { %v2516_v16 = vpop.f32.mrb[9].mxu1 }
 0x177   :  { %v2518_v15 = vpop.f32.mrb[10].mxu1 }
 0x178   :  { %v2520_v45 = vpop.f32.mrb[11].mxu1 }
 0x17d   :  { %v2522_v46 = vpop.f32.mrb[12].mxu1 }
 0x17e   :  { %v2524_v3 = vpop.f32.mrb[13].mxu1 }
 0x17f   :  { %v2526_v6 = vpop.f32.mrb[14].mxu1 }
 0x180   :  { %v2528_v49 = vpop.f32.mrb[15].mxu1 }
 0x1f7   :  { %v1355_v53 = vpop.xlane.xlu0 %1354 }
 0x1f8   :  { %v1386_v23 = vadd.f32 %v1355_v53, %v1338_v18 }
 0x1fa   :  { %1402 = vst.msk [vmem:[#allocation5] sm:$0xff] %vm3369_vm0, %v1386_v23  ;;  %vm2709_vm0 = vmand %vm1195_vm13, %vm777_vm11  ;;  %vm3429_vm11 = vcmp.ne.s32.totalorder %v741_v9, %v2491_v30  ;;  %vm3372_vm13 = vcmp.ne.s32.totalorder %v747_v13, %v2491_v30  ;;  %v3436_v23 = vmov 0 }
 0x1fb   :  { %vm1214_vm2 = vmand %vm1198_vm4, %vm3429_vm11  ;;  %v2754_v54 = vsel %vm2709_vm0, 1.0, %v2075_v0  ;;  %vm1201_vm4 = vcmp.gt.f32.partialorder %v2510_v1, 0.5  ;;  %vm3375_vm0 = vcmp.ne.s32.totalorder %v2735_v50, %v2491_v30 }
 0x1fc   :  { %vm2747_vm7 = vmand %vm3372_vm13, %vm3377_vm6  ;;  %v2758_v55 = vsel %vm1214_vm2, 1.0, %v2075_v0 }
 0x1fd   :  { %v3431_v38 = vsel %vm2747_vm7, 4294967295, %v3430_v38  ;;  %vm2767_vm13 = vmand %vm3373_vm15, %vm3377_vm6  ;;  %vm1204_vm15 = vcmp.gt.f32.partialorder %v2514_v42, 0.5 }
 0x1fe   :  { %v3433_v20 = vsel %vm2767_vm13, 4294967295, %v3432_v20  ;;  %vm3440_vm13 = vcmp.gt.f32.partialorder %v2512_v41, 0.5 }
 0x204   :  { %v2569_v39 = vpop.f32.mrb[0].mxu0 }
 0x205   :  { %v2583_v58 = vpop.f32.mrb[1].mxu0  ;;  %v811_v44 = vsel %vm3377_vm6, %v2569_v39, -1e+30  ;;  %v1260_v43 = vmul.f32 %v2569_v39, %v2572_v34 }
 0x206   :  { %829 = vmax.xlane.f32.xlu0 %v811_v44  ;;  %v2601_v63 = vpop.f32.mrb[2].mxu0  ;;  %v809_v47 = vsel %vm3377_vm6, %v2583_v58, -1e+30  ;;  %v1258_v22 = vmul.f32 %v2503_v37, %v2583_v58  ;;  %v2723_v37 = vadd.s32 88, %v2489_v33 }
 0x207   :  { %1278 = vadd.xlane.f32.xlu1 %v1260_v43  ;;  %v2609_v4 = vpop.f32.mrb[3].mxu0  ;;  %v812_v24 = vsel %vm3377_vm6, %v2601_v63, -1e+30  ;;  %v1261_v2 = vmul.f32 %v2601_v63, %v2716_v29 }
 0x208   :  { %v810_v31 = vsel %vm3377_vm6, %v2609_v4, -1e+30  ;;  %vm3374_vm11 = vcmp.ne.s32.totalorder %v2723_v37, %v2491_v30  ;;  %v1259_v44 = vmul.f32 %v2754_v54, %v2609_v4 }
 0x209   :  { %vm2785_vm2 = vmand %vm3374_vm11, %vm3377_vm6 }
 0x20a   :  { %825 = vmax.xlane.f32.xlu0 %v809_v47  ;;  %v3435_v12 = vsel %vm2785_vm2, 4294967295, %v3434_v12  ;;  %v2793_v47 = vadd.s32 112, %v2489_v33  ;;  %vm2803_vm11 = vmand %vm3375_vm0, %vm3377_vm6  ;;  %vm3438_vm0 = vcmp.ne.s32.totalorder %v2612_v8, %v2491_v30 }
 0x20b   :  { %831 = vmax.xlane.f32.xlu1 %v812_v24  ;;  %v2077_v24 = vmov 0   ;;  %v3437_v23 = vsel %vm2803_vm11, 4294967295, %v3436_v23  ;;  %vm1217_vm7 = vmand %vm1201_vm4, %vm3438_vm0  ;;  %vm3443_vm4 = vcmp.ne.s32.totalorder %v747_v13, %v2491_v30  ;;  %v3449_v13 = vmov 0 }
 0x20c   :  { %v2661_v25 = vpop.f32.mrb[4].mxu0  ;;  %1823 = vset.pattern.permute.xlu1 %v2077_v24  ;;  %1824 = vset.pattern.permute.xlu0 %v2077_v24  ;;  %v2832_v24 = vadd.s32 120, %v2489_v33  ;;  %vm1220_vm0 = vmand %vm1204_vm15, %vm3443_vm4  ;;  %vm3383_vm1 = vcmp.ne.s32.totalorder %v2793_v47, %v2491_v30 }
 0x20d   :  { %v2677_v14 = vpop.f32.mrb[5].mxu0  ;;  %v1264_v36 = vmul.f32 %v2661_v25, %v2664_v26  ;;  %v3526_v35 = vsel %vm2644_vm5, %v2661_v25, -1e+30  ;;  %vm3535_vm5 = vnez %v3433_v20 }
 0x20e   :  { %1274 = vadd.xlane.f32.xlu0 %v1258_v22  ;;  %v2697_v56 = vpop.f32.mrb[6].mxu0  ;;  %v1262_v42 = vmul.f32 %v2758_v55, %v2677_v14  ;;  %vm3384_vm4 = vcmp.ne.s32.totalorder %v2832_v24, %v2491_v30 }
 0x20f   :  { %827 = vmax.xlane.f32.xlu1 %v810_v31  ;;  %v2720_v7 = vpop.f32.mrb[7].mxu0  ;;  %v816_v43 = vsel %vm3377_vm6, %v2697_v56, -1e+30  ;;  %v2811_v31 = vadd.s32 96, %v2489_v33 }
 0x211   :  { %vm3385_vm2 = vcmp.ne.s32.totalorder %v2811_v31, %v2491_v30 }
 0x212   :  { %1280 = vadd.xlane.f32.xlu0 %v1261_v2  ;;  %v815_v2 = vsel %vm3377_vm6, %v2661_v25, -1e+30  ;;  %vm3439_vm6 = vcmp.ne.s32.totalorder %v2626_v17, %v2491_v30  ;;  %v2870_v17 = vsel %vm1217_vm7, 1.0, %v2075_v0 }
 0x213   :  { %1286 = vadd.xlane.f32.xlu1 %v1264_v36  ;;  %vm2842_vm3 = vmand %vm3440_vm13, %vm3439_vm6  ;;  %vm3444_vm13 = vcmp.lt.s32.totalorder %v2491_v30, 8  ;;  %v3453_v36 = vmov 0  ;;  %v1265_v5 = vmul.f32 %v2697_v56, %v2870_v17 }
 0x214   :  { %v2776_v9 = vpop.f32.mrb[8].mxu0  ;;  %vm2862_vm9 = vmand %vm3383_vm1, %vm3444_vm13  ;;  %v2925_v28 = vsel %vm2842_vm3, 1.0, %v2075_v0  ;;  %vm3459_vm3 = vcmp.lt.s32.totalorder %v2491_v30, 8 }
 0x215   :  { %v2790_v18 = vpop.f32.mrb[9].mxu0  ;;  %vm3447_vm15 = vmmov %vm3444_vm13  ;;  %v1263_v1 = vmul.f32 %v2925_v28, %v2720_v7 }
 0x216   :  { %1276 = vadd.xlane.f32.xlu0 %v1259_v44  ;;  %v2808_v22 = vpop.f32.mrb[10].mxu0  ;;  %v813_v41 = vsel %vm3447_vm15, %v2677_v14, -1e+30  ;;  %vm3448_vm6 = vmmov %vm3444_vm13 }
 0x217   :  { %839 = vmax.xlane.f32.xlu1 %v816_v43  ;;  %v2829_v44 = vpop.f32.mrb[11].mxu0  ;;  %vm2879_vm13 = vmand %vm3385_vm2, %vm3448_vm6  ;;  %vm1208_vm2 = vcmp.gt.f32.partialorder %v2522_v46, 0.5 }
 0x218   :  { %v3450_v13 = vsel %vm2879_vm13, 4294967295, %v3449_v13  ;;  %vm3451_vm1 = vmmov %vm3448_vm6 }
 0x219   :  { %v814_v43 = vsel %vm3451_vm1, %v2720_v7, -1e+30  ;;  %vm3452_vm7 = vmmov %vm3451_vm1 }
 0x21a   :  { %837 = vmax.xlane.f32.xlu0 %v815_v2  ;;  %v2887_v2 = vsel %vm1220_vm0, 1.0, %v2075_v0  ;;  %vm2896_vm15 = vmand %vm3384_vm4, %vm3452_vm7  ;;  %vm3455_vm0 = vcmp.ne.s32.totalorder %v2814_v61, %v2491_v30  ;;  %vm1202_vm7 = vcmp.gt.f32.partialorder %v2516_v16, 0.5  ;;  %vm1205_vm4 = vcmp.gt.f32.partialorder %v2518_v15, 0.5  ;;  %v1248_v16 = vld [vmem:[#allocation4 + $0x30] sm:$0xff] }
 0x21b   :  { %1282 = vadd.xlane.f32.xlu1 %v1262_v42  ;;  %v3454_v36 = vsel %vm2896_vm15, 4294967295, %v3453_v36  ;;  %vm2910_vm6 = vmand %vm3455_vm0, %vm3451_vm1  ;;  %vm3458_vm1 = vcmp.ne.s32.totalorder %v2700_v32, %v2491_v30 }
 0x21c   :  { %v2889_v42 = vpop.f32.mrb[12].mxu0  ;;  %v3457_v51 = vsel %vm2910_vm6, 4294967295, %v3456_v51  ;;  %vm1218_vm0 = vmand %vm1202_vm7, %vm3458_vm1  ;;  %vm3461_vm1 = vcmp.ne.s32.totalorder %v2723_v37, %v2491_v30  ;;  %vm3462_vm6 = vcmp.ne.s32.totalorder %v2793_v47, %v2491_v30 }
 0x21d   :  { %v2900_v8 = vpop.f32.mrb[13].mxu0  ;;  %v2946_v53 = vsel %vm1218_vm0, 1.0, %v2075_v0  ;;  %vm3460_vm7 = vmmov %vm3459_vm3  ;;  %vm1203_vm0 = vcmp.gt.f32.partialorder %v2520_v45, 0.5  ;;  %v3538_v20 = vsel %vm2862_vm9, %v2889_v42, -1e+30 }
 0x21e   :  { %833 = vmax.xlane.f32.xlu0 %v813_v41  ;;  %v2917_v62 = vpop.f32.mrb[14].mxu0  ;;  %v1268_v41 = vmul.f32 %v2776_v9, %v2887_v2  ;;  %v819_v32 = vsel %vm3460_vm7, %v2776_v9, -1e+30  ;;  %vm1224_vm15 = vmand %vm1208_vm2, %vm3462_vm6  ;;  %vm3466_vm2 = vcmp.ne.s32.totalorder %v2811_v31, %v2491_v30 }
 0x21f   :  { %835 = vmax.xlane.f32.xlu1 %v814_v43  ;;  %v2929_v48 = vpop.f32.mrb[15].mxu0  ;;  %v820_v43 = vsel %vm3459_vm3, %v2808_v22, -1e+30  ;;  %vm1221_vm3 = vmand %vm1205_vm4, %vm3461_vm1  ;;  %v2975_v37 = vsel %vm1224_vm15, 1.0, %v2075_v0 }
 0x220   :  { %vm3463_vm11 = vmmov %vm3460_vm7  ;;  %v2966_v46 = vsel %vm1221_vm3, 1.0, %v2075_v0  ;;  %vm3464_vm7 = vcmp.ne.s32.totalorder %v2735_v50, %v2491_v30  ;;  %v1272_v50 = vmul.f32 %v2889_v42, %v2975_v37  ;;  %vm3469_vm3 = vcmp.ne.s32.totalorder %v2832_v24, %v2491_v30 }
 0x221   :  { %v817_v15 = vsel %vm3463_vm11, %v2790_v18, -1e+30  ;;  %vm1219_vm13 = vmand %vm1203_vm0, %vm3464_vm7  ;;  %v1269_v47 = vmul.f32 %v2808_v22, %v2966_v46  ;;  %vm1207_vm7 = vcmp.gt.f32.partialorder %v2528_v49, 0.5 }
 0x222   :  { %1288 = vadd.xlane.f32.xlu0 %v1265_v5  ;;  %v1266_v5 = vmul.f32 %v2946_v53, %v2790_v18  ;;  %vm3465_vm4 = vmmov %vm3463_vm11  ;;  %vm1206_vm11 = vcmp.gt.f32.partialorder %v2524_v3, 0.5 }
 0x223   :  { %1294 = vadd.xlane.f32.xlu1 %v1268_v41  ;;  %v818_v45 = vsel %vm3465_vm4, %v2829_v44, -1e+30  ;;  %v2981_v41 = vsel %vm1219_vm13, 1.0, %v2075_v0  ;;  %vm1222_vm6 = vmand %vm1206_vm11, %vm3466_vm2  ;;  %vm1209_vm13 = vcmp.gt.f32.partialorder %v2526_v6, 0.5  ;;  %vm3471_vm11 = vcmp.ne.s32.totalorder %v2814_v61, %v2491_v30  ;;  %v1244_v61 = vld [vmem:[#allocation4 + $0x10] sm:$0xff] }
 0x224   :  { %vm3467_vm15 = vmmov %vm3465_vm4 }
 0x225   :  { %v824_v3 = vsel %vm3467_vm15, %v2917_v62, -1e+30  ;;  %vm3468_vm1 = vmmov %vm3465_vm4  ;;  %vm3475_vm15 = vcmask 7168  }
 0x226   :  { %1284 = vadd.xlane.f32.xlu0 %v1263_v1  ;;  %v1267_v1 = vmul.f32 %v2981_v41, %v2829_v44  ;;  %v823_v31 = vsel %vm3468_vm1, %v2889_v42, -1e+30  ;;  %vm1225_vm0 = vmand %vm1209_vm13, %vm3469_vm3  ;;  %v1346_v42 = vld [vmem:[#allocation5 + $0x40] sm:$0xff] }
 0x227   :  { %847 = vmax.xlane.f32.xlu1 %v820_v43  ;;  %v2994_v43 = vsel %vm1222_vm6, 1.0, %v2075_v0  ;;  %vm3470_vm4 = vmmov %vm3468_vm1 }
 0x228   :  { %v821_v6 = vsel %vm3470_vm4, %v2900_v8, -1e+30  ;;  %vm1223_vm2 = vmand %vm1207_vm7, %vm3471_vm11 }
 0x229   :  { %vm3472_vm6 = vmmov %vm3468_vm1 }
 0x22a   :  { %845 = vmax.xlane.f32.xlu0 %v819_v32  ;;  %v1270_v32 = vmul.f32 %v2994_v43, %v2900_v8  ;;  %v822_v24 = vsel %vm3472_vm6, %v2929_v48, -1e+30  ;;  %vm3477_vm13 = vmmov %vm3475_vm15 }
 0x22b   :  { %1290 = vadd.xlane.f32.xlu1 %v1266_v5  ;;  %v3010_v5 = vsel %vm1225_vm0, 1.0, %v2075_v0  ;;  %vm3480_vm1 = vmmov %vm3477_vm13 }
 0x22c   :  { %v1273_v49 = vmul.f32 %v2917_v62, %v3010_v5  ;;  %vm3482_vm3 = vmmov %vm3480_vm1 }
 0x22d   :  { %vm3484_vm0 = vmmov %vm3480_vm1 }
 0x22e   :  { %841 = vmax.xlane.f32.xlu0 %v817_v15  ;;  %v3021_v15 = vsel %vm1223_vm2, 1.0, %v2075_v0  ;;  %vm3485_vm7 = vmmov %vm3484_vm0 }
 0x22f   :  { %843 = vmax.xlane.f32.xlu1 %v818_v45  ;;  %v1271_v45 = vmul.f32 %v3021_v15, %v2929_v48  ;;  %vm3486_vm4 = vmmov %vm3484_vm0 }
 0x230   :  { %vm3488_vm11 = vmmov %vm3484_vm0 }
 0x231   :  { %vm3490_vm2 = vmmov %vm3484_vm0 }
 0x232   :  { %1296 = vadd.xlane.f32.xlu0 %v1269_v47  ;;  %v3025_v47 = vld [vmem:[#allocation2 + $0x10] sm:$0xff]  ;;  %vm3491_vm6 = vmmov %vm3484_vm0 }
 0x233   :  { %1302 = vadd.xlane.f32.xlu1 %v1272_v50 }
 0x236   :  { %1292 = vadd.xlane.f32.xlu0 %v1267_v1 }
 0x237   :  { %855 = vmax.xlane.f32.xlu1 %v824_v3 }
 0x23a   :  { %853 = vmax.xlane.f32.xlu0 %v823_v31  ;;  %v3030_v31 = vld [vmem:[#allocation2] sm:$0xff] }
 0x23b   :  { %1298 = vadd.xlane.f32.xlu1 %v1270_v32  ;;  %3474 = vst [vmem:[#allocation17_spill] sm:$0xff] %v3030_v31  ;;  %v3037_v32 = vld [vmem:[#allocation2 + $0x18] sm:$0xff] }
 0x23c   :  { %3476 = vst [vmem:[#allocation18_spill] sm:$0xff] %v3037_v32 }
 0x23e   :  { %849 = vmax.xlane.f32.xlu0 %v821_v6 }
 0x23f   :  { %851 = vmax.xlane.f32.xlu1 %v822_v24 }
 0x242   :  { %1304 = vadd.xlane.f32.xlu0 %v1273_v49 }
 0x246   :  { %1300 = vadd.xlane.f32.xlu0 %v1271_v45 }
 0x293   :  { %v830_v50 = vpop.xlane.xlu0 %829 }
 0x294   :  { %v3028_v30 = vmax.f32 %v3025_v47, %v830_v50  ;;  %v1279_v1 = vpop.xlane.xlu1 %1278 }
 0x295   :  { %v1308_v3 = vadd.f32 %v1279_v1, %v1244_v61  ;;  %v1242_v61 = vld [vmem:[#allocation4] sm:$0xff]  ;;  %v3051_v1 = vld [vmem:[#allocation2 + $0x8] sm:$0xff] }
 0x296   :  { %3473 = vst [vmem:[#allocation16_spill] sm:$0xff] %v3028_v30  ;;  %1180 = vst.msk [vmem:[#allocation2 + $0x10] sm:$0xff] %vm3475_vm15, %v3028_v30  ;;  %917 = vperm.xlu1 %1823, %v3028_v30   ;;  %v3114_v30 = vld [vmem:[#allocation2 + $0x50] sm:$0xff] }
 0x297   :  { %1324 = vst.msk [vmem:[#allocation4 + $0x10] sm:$0xff] %vm3477_vm13, %v1308_v3  ;;  %v826_v6 = vpop.xlane.xlu0 %825  ;;  %3481 = vst [vmem:[#allocation21_spill] sm:$0xff] %v3051_v1 }
 0x298   :  { %v3041_v24 = vmax.f32 %v3030_v31, %v826_v6  ;;  %v832_v49 = vpop.xlane.xlu1 %831  ;;  %vm3494_vm15 = vmmov %vm3484_vm0  ;;  %3501 = vst [vmem:[#allocation29_spill] sm:$0xff] %v3114_v30 }
 0x299   :  { %v3044_v45 = vmax.f32 %v3037_v32, %v832_v49  ;;  %vm3495_vm13 = vmmov %vm3484_vm0 }
 0x29a   :  { %3478 = vst [vmem:[#allocation19_spill] sm:$0xff] %v3041_v24  ;;  %1178 = vst.msk [vmem:[#allocation2] sm:$0xff] %vm3480_vm1, %v3041_v24  ;;  %907 = vperm.xlu0 %1824, %v3041_v24  }
 0x29b   :  { %3479 = vst [vmem:[#allocation20_spill] sm:$0xff] %v3044_v45  ;;  %1181 = vst.msk [vmem:[#allocation2 + $0x18] sm:$0xff] %vm3482_vm3, %v3044_v45  ;;  %v1275_v6 = vpop.xlane.xlu0 %1274  ;;  %922 = vperm.xlu1 %1823, %v3044_v45  }
 0x29c   :  { %v1306_v49 = vadd.f32 %v1275_v6, %v1242_v61  ;;  %v828_v0 = vpop.xlane.xlu1 %827  ;;  %v1243_v61 = vld [vmem:[#allocation4 + $0x8] sm:$0xff]  ;;  %vm3497_vm1 = vmmov %vm3484_vm0 }
 0x29d   :  { %v3059_v50 = vmax.f32 %v3051_v1, %v828_v0  ;;  %v3068_v0 = vld [vmem:[#allocation2 + $0x38] sm:$0xff]  ;;  %vm3498_vm3 = vmmov %vm3484_vm0 }
 0x29e   :  { %1322 = vst.msk [vmem:[#allocation4] sm:$0xff] %vm3484_vm0, %v1306_v49  ;;  %3487 = vst [vmem:[#allocation23_spill] sm:$0xff] %v3068_v0 }
 0x29f   :  { %3483 = vst [vmem:[#allocation22_spill] sm:$0xff] %v3059_v50  ;;  %1179 = vst.msk [vmem:[#allocation2 + $0x8] sm:$0xff] %vm3485_vm7, %v3059_v50  ;;  %v1281_v3 = vpop.xlane.xlu0 %1280  ;;  %912 = vperm.xlu1 %1823, %v3059_v50  }
 0x2a0   :  { %v1309_v59 = vadd.f32 %v1281_v3, %v1245_v11  ;;  %v1287_v45 = vpop.xlane.xlu1 %1286  ;;  %v1246_v11 = vld [vmem:[#allocation4 + $0x20] sm:$0xff]  ;;  %vm3500_vm7 = vmmov %vm3484_vm0 }
 0x2a1   :  { %v1312_v6 = vadd.f32 %v1287_v45, %v1248_v16  ;;  %v3084_v45 = vld [vmem:[#allocation2 + $0x20] sm:$0xff] }
 0x2a2   :  { %1325 = vst.msk [vmem:[#allocation4 + $0x18] sm:$0xff] %vm3486_vm4, %v1309_v59  ;;  %3493 = vst [vmem:[#allocation26_spill] sm:$0xff] %v3084_v45 }
 0x2a3   :  { %v1277_v32 = vpop.xlane.xlu0 %1276  ;;  %1328 = vst.msk [vmem:[#allocation4 + $0x30] sm:$0xff] %vm3488_vm11, %v1312_v6  ;;  %v3091_v6 = vld [vmem:[#allocation2 + $0x28] sm:$0xff]  ;;  %vm3502_vm4 = vmmov %vm3484_vm0 }
 0x2a4   :  { %v1307_v49 = vadd.f32 %v1277_v32, %v1243_v61  ;;  %v840_v24 = vpop.xlane.xlu1 %839  ;;  %vm3503_vm11 = vmmov %vm3484_vm0 }
 0x2a5   :  { %v3074_v1 = vmax.f32 %v3068_v0, %v840_v24  ;;  %v1249_v0 = vld [vmem:[#allocation4 + $0x38] sm:$0xff]  ;;  %v1252_v24 = vld [vmem:[#allocation4 + $0x50] sm:$0xff] }
 0x2a6   :  { %1323 = vst.msk [vmem:[#allocation4 + $0x8] sm:$0xff] %vm3490_vm2, %v1307_v49  ;;  %vm3506_vm2 = vmmov %vm3484_vm0 }
 0x2a7   :  { %v838_v3 = vpop.xlane.xlu0 %837  ;;  %1185 = vst.msk [vmem:[#allocation2 + $0x38] sm:$0xff] %vm3491_vm6, %v3074_v1  ;;  %vm3508_vm6 = vmmov %vm3484_vm0 }
 0x2a8   :  { %v3082_v59 = vmax.f32 %v3071_v10, %v838_v3  ;;  %v1283_v32 = vpop.xlane.xlu1 %1282 }
 0x2a9   :  { %v1310_v61 = vadd.f32 %v1283_v32, %v1246_v11  ;;  %v3111_v32 = vld [vmem:[#allocation2 + $0x58] sm:$0xff] }
 0x2aa   :  { %3492 = vst [vmem:[#allocation25_spill] sm:$0xff] %v3082_v59  ;;  %1184 = vst.msk [vmem:[#allocation2 + $0x30] sm:$0xff] %vm3494_vm15, %v3082_v59  ;;  %937 = vperm.xlu1 %1823, %v3082_v59  }
 0x2ab   :  { %v834_v49 = vpop.xlane.xlu0 %833  ;;  %1326 = vst.msk [vmem:[#allocation4 + $0x20] sm:$0xff] %vm3495_vm13, %v1310_v61  ;;  %3499 = vst [vmem:[#allocation28_spill] sm:$0xff] %v3111_v32 }
 0x2ac   :  { %v3095_v3 = vmax.f32 %v3084_v45, %v834_v49  ;;  %v836_v16 = vpop.xlane.xlu1 %835  ;;  %vm3510_vm15 = vmmov %vm3484_vm0 }
 0x2ad   :  { %v3098_v11 = vmax.f32 %v3091_v6, %v836_v16  ;;  %v1247_v16 = vld [vmem:[#allocation4 + $0x28] sm:$0xff]  ;;  %vm3511_vm13 = vmmov %vm3484_vm0 }
 0x2ae   :  { %3496 = vst [vmem:[#allocation27_spill] sm:$0xff] %v3095_v3  ;;  %1182 = vst.msk [vmem:[#allocation2 + $0x20] sm:$0xff] %vm3497_vm1, %v3095_v3  ;;  %927 = vperm.xlu1 %1823, %v3095_v3  }
 0x2af   :  { %v1289_v59 = vpop.xlane.xlu0 %1288  ;;  %1183 = vst.msk [vmem:[#allocation2 + $0x28] sm:$0xff] %vm3498_vm3, %v3098_v11  ;;  %vm3512_vm1 = vmmov %vm3484_vm0 }
 0x2b0   :  { %v1313_v49 = vadd.f32 %v1289_v59, %v1249_v0  ;;  %v1295_v10 = vpop.xlane.xlu1 %1294  ;;  %v3157_v59 = vld [vmem:[#allocation2 + $0x78] sm:$0xff]  ;;  %vm3514_vm3 = vmmov %vm3484_vm0 }
 0x2b1   :  { %v1316_v50 = vadd.f32 %v1295_v10, %v1252_v24  ;;  %v1250_v10 = vld [vmem:[#allocation4 + $0x40] sm:$0xff]  ;;  %3513 = vst [vmem:[#allocation34_spill] sm:$0xff] %v3157_v59 }
 0x2b2   :  { %1329 = vst.msk [vmem:[#allocation4 + $0x38] sm:$0xff] %vm3484_vm0, %v1313_v49  ;;  %942 = vperm.xlu1 %1823, %v3074_v1   ;;  %v3136_v49 = vld [vmem:[#allocation2 + $0x48] sm:$0xff] }
 0x2b3   :  { %v1285_v45 = vpop.xlane.xlu0 %1284  ;;  %1332 = vst.msk [vmem:[#allocation4 + $0x50] sm:$0xff] %vm3500_vm7, %v1316_v50  ;;  %3507 = vst [vmem:[#allocation32_spill] sm:$0xff] %v3136_v49 }
 0x2b4   :  { %v1311_v3 = vadd.f32 %v1285_v45, %v1247_v16  ;;  %v848_v31 = vpop.xlane.xlu1 %847  ;;  %vm3515_vm7 = vmmov %vm3484_vm0 }
 0x2b5   :  { %v3117_v61 = vmax.f32 %v3111_v32, %v848_v31  ;;  %v3129_v31 = vld [vmem:[#allocation2 + $0x40] sm:$0xff] }
 0x2b6   :  { %1327 = vst.msk [vmem:[#allocation4 + $0x28] sm:$0xff] %vm3502_vm4, %v1311_v3  ;;  %932 = vperm.xlu1 %1823, %v3098_v11   ;;  %3505 = vst [vmem:[#allocation31_spill] sm:$0xff] %v3129_v31  ;;  %v1256_v3 = vld [vmem:[#allocation4 + $0x70] sm:$0xff] }
 0x2b7   :  { %v846_v0 = vpop.xlane.xlu0 %845  ;;  %1189 = vst.msk [vmem:[#allocation2 + $0x58] sm:$0xff] %vm3503_vm11, %v3117_v61  ;;  %vm3516_vm4 = vmmov %vm3484_vm0 }
 0x2b8   :  { %v3126_v50 = vmax.f32 %v3114_v30, %v846_v0  ;;  %v1291_v45 = vpop.xlane.xlu1 %1290  ;;  %vm3517_vm11 = vmmov %vm3484_vm0 }
 0x2b9   :  { %1358 = vadd.xlane.f32.xlu0 %v2572_v34  ;;  %v1314_v24 = vadd.f32 %v1291_v45, %v1250_v10  ;;  %v1253_v10 = vld [vmem:[#allocation4 + $0x58] sm:$0xff] }
 0x2ba   :  { %3504 = vst [vmem:[#allocation30_spill] sm:$0xff] %v3126_v50  ;;  %1188 = vst.msk [vmem:[#allocation2 + $0x50] sm:$0xff] %vm3506_vm2, %v3126_v50  ;;  %957 = vperm.xlu1 %1823, %v3126_v50  }
 0x2bb   :  { %v842_v16 = vpop.xlane.xlu0 %841  ;;  %1330 = vst.msk [vmem:[#allocation4 + $0x40] sm:$0xff] %vm3508_vm6, %v1314_v24  ;;  %vm3518_vm2 = vmmov %vm3484_vm0 }
 0x2bc   :  { %v3140_v0 = vmax.f32 %v3129_v31, %v842_v16  ;;  %v844_v34 = vpop.xlane.xlu1 %843  ;;  %v3161_v16 = vld [vmem:[#allocation2 + $0x70] sm:$0xff]  ;;  %vm3519_vm6 = vmmov %vm3484_vm0 }
 0x2bd   :  { %1362 = vadd.xlane.f32.xlu0 %v2758_v55  ;;  %v3144_v45 = vmax.f32 %v3136_v49, %v844_v34  ;;  %v1251_v34 = vld [vmem:[#allocation4 + $0x48] sm:$0xff] }
 0x2be   :  { %3509 = vst [vmem:[#allocation33_spill] sm:$0xff] %v3140_v0  ;;  %1186 = vst.msk [vmem:[#allocation2 + $0x40] sm:$0xff] %vm3510_vm15, %v3140_v0  ;;  %947 = vperm.xlu1 %1823, %v3140_v0  }
 0x2bf   :  { %v1297_v24 = vpop.xlane.xlu0 %1296  ;;  %1187 = vst.msk [vmem:[#allocation2 + $0x48] sm:$0xff] %vm3511_vm13, %v3144_v45  ;;  %vm3520_vm15 = vmmov %vm3484_vm0 }
 0x2c0   :  { %v1317_v55 = vadd.f32 %v1297_v24, %v1253_v10  ;;  %v1303_v32 = vpop.xlane.xlu1 %1302  ;;  %vm3521_vm13 = vmmov %vm3484_vm0 }
 0x2c1   :  { %1366 = vadd.xlane.f32.xlu0 %v2664_v26  ;;  %v1320_v50 = vadd.f32 %v1303_v32, %v1256_v3  ;;  %v1254_v26 = vld [vmem:[#allocation4 + $0x60] sm:$0xff]  ;;  %v1257_v3 = vld [vmem:[#allocation4 + $0x78] sm:$0xff] }
 0x2c2   :  { %1333 = vst.msk [vmem:[#allocation4 + $0x58] sm:$0xff] %vm3512_vm1, %v1317_v55  ;;  %vm3537_vm1 = vmmov %vm3484_vm0 }
 0x2c3   :  { %v1293_v31 = vpop.xlane.xlu0 %1292  ;;  %1336 = vst.msk [vmem:[#allocation4 + $0x70] sm:$0xff] %vm3514_vm3, %v1320_v50  ;;  %vm3539_vm3 = vmmov %vm3484_vm0 }
 0x2c4   :  { %v1315_v0 = vadd.f32 %v1293_v31, %v1251_v34  ;;  %v856_v30 = vpop.xlane.xlu1 %855  ;;  %vm3542_vm9 = vmmov %vm3537_vm1 }
 0x2c5   :  { %1370 = vadd.xlane.f32.xlu0 %v2946_v53  ;;  %v3164_v10 = vmax.f32 %v3157_v59, %v856_v30  ;;  %v3174_v53 = vld [vmem:[#allocation2 + $0x60] sm:$0xff]  ;;  %v1255_v59 = vld [vmem:[#allocation4 + $0x68] sm:$0xff] }
 0x2c6   :  { %1331 = vst.msk [vmem:[#allocation4 + $0x48] sm:$0xff] %vm3484_vm0, %v1315_v0  ;;  %v3181_v0 = vld [vmem:[#allocation2 + $0x68] sm:$0xff]  ;;  %vm3540_vm0 = vnez %v3450_v13 }
 0x2c7   :  { %v854_v32 = vpop.xlane.xlu0 %853  ;;  %1193 = vst.msk [vmem:[#allocation2 + $0x78] sm:$0xff] %vm3515_vm7, %v3164_v10  ;;  %vm3543_vm7 = vmmov %vm3537_vm1 }
 0x2c8   :  { %v3172_v50 = vmax.f32 %v3161_v16, %v854_v32  ;;  %v1299_v31 = vpop.xlane.xlu1 %1298 }
 0x2c9   :  { %v1318_v24 = vadd.f32 %v1299_v31, %v1254_v26 }
 0x2ca   :  { %1192 = vst.msk [vmem:[#allocation2 + $0x70] sm:$0xff] %vm3516_vm4, %v3172_v50  ;;  %977 = vperm.xlu1 %1823, %v3172_v50   ;;  %vm3544_vm4 = vnez %v3437_v23 }
 0x2cb   :  { %v850_v55 = vpop.xlane.xlu0 %849  ;;  %1334 = vst.msk [vmem:[#allocation4 + $0x60] sm:$0xff] %vm3517_vm11, %v1318_v24  ;;  %vm3546_vm11 = vnez %v3435_v12 }
 0x2cc   :  { %v3185_v34 = vmax.f32 %v3174_v53, %v850_v55  ;;  %v852_v32 = vpop.xlane.xlu1 %851 }
 0x2cd   :  { %v3188_v26 = vmax.f32 %v3181_v0, %v852_v32 }
 0x2ce   :  { %v1061_v31 = vsub.f32 %v3174_v53, %v3185_v34  ;;  %1190 = vst.msk [vmem:[#allocation2 + $0x60] sm:$0xff] %vm3518_vm2, %v3185_v34  ;;  %967 = vperm.xlu1 %1823, %v3185_v34   ;;  %vm3548_vm2 = vnez %v3454_v36  ;;  %v1045_v53 = vld [vmem:[#allocation3 + $0x60] sm:$0xff] }
 0x2cf   :  { %v1305_v30 = vpop.xlane.xlu0 %1304  ;;  %v1062_v24 = vsub.f32 %v3181_v0, %v3188_v26  ;;  %1191 = vst.msk [vmem:[#allocation2 + $0x68] sm:$0xff] %vm3519_vm6, %v3188_v26  ;;  %vm3550_vm6 = vnez %v3457_v51  ;;  %v1341_v51 = vld [vmem:[#allocation5 + $0x18] sm:$0xff] }
 0x2d0   :  { %v1321_v55 = vadd.f32 %v1305_v30, %v1257_v3  ;;  %v3551_v12 = vsel %vm3550_vm6, %v2929_v48, -1e+30 }
 0x2d2   :  { %1337 = vst.msk [vmem:[#allocation4 + $0x78] sm:$0xff] %vm3520_vm15, %v1321_v55  ;;  %vm3552_vm15 = vmmov %vm3537_vm1 }
 0x2d3   :  { %v1301_v32 = vpop.xlane.xlu0 %1300 }
 0x2d4   :  { %v1319_v49 = vadd.f32 %v1301_v32, %v1255_v59 }
 0x2d6   :  { %1335 = vst.msk [vmem:[#allocation4 + $0x68] sm:$0xff] %vm3521_vm13, %v1319_v49  ;;  %vm3553_vm13 = vmmov %vm3537_vm1 }
 0x2db   :  { %952 = vperm.xlu0 %1824, %v3144_v45  }
 0x2df   :  { %962 = vperm.xlu0 %1824, %v3117_v61  }
 0x2e3   :  { %982 = vperm.xlu0 %1824, %v3164_v10  }
 0x2e7   :  { %972 = vperm.xlu0 %1824, %v3188_v26  }
 0x2f2   :  { %1356 = vadd.xlane.f32.xlu1 %v2754_v54  ;;  %v3522_v54 = vsel %vm2554_vm8, %v2569_v39, -1e+30  ;;  %v3525_v39 = vsel %vm2597_vm14, %v2609_v4, -1e+30  ;;  %vm3527_vm8 = vnez %v3422_v21  ;;  %vm3533_vm14 = vnez %v3431_v38 }
 0x2f3   :  { %v3528_v4 = vsel %vm3527_vm8, %v2677_v14, -1e+30  ;;  %vm3554_vm8 = vmmov %vm3537_vm1 }
 0x2f6   :  { %1360 = vadd.xlane.f32.xlu1 %v2716_v29 }
 0x2fa   :  { %1364 = vadd.xlane.f32.xlu1 %v2925_v28 }
 0x2fe   :  { %1368 = vadd.xlane.f32.xlu1 %v2870_v17  ;;  %v3523_v17 = vsel %vm2564_vm10, %v2583_v58, -1e+30  ;;  %vm3529_vm10 = vnez %v3424_v27  ;;  %v3534_v27 = vsel %vm3533_vm14, %v2776_v9, -1e+30  ;;  %vm3557_vm14 = vmmov %vm3537_vm1 }
 0x2ff   :  { %v3530_v52 = vsel %vm3529_vm10, %v2697_v56, -1e+30  ;;  %vm3555_vm10 = vmmov %vm3537_vm1 }
 0x302   :  { %1372 = vadd.xlane.f32.xlu1 %v2981_v41 }
 0x306   :  { %1376 = vadd.xlane.f32.xlu1 %v2966_v46  ;;  %1374 = vadd.xlane.f32.xlu0 %v2887_v2  ;;  %v3524_v2 = vsel %vm2578_vm12, %v2601_v63, -1e+30  ;;  %vm3531_vm12 = vnez %v3426_v57  ;;  %v3536_v57 = vsel %vm3535_vm5, %v2790_v18, -1e+30  ;;  %vm3558_vm5 = vmmov %vm3537_vm1 }
 0x30a   :  { %1380 = vadd.xlane.f32.xlu1 %v3021_v15  ;;  %1378 = vadd.xlane.f32.xlu0 %v2994_v43 }
 0x315   :  { %v918_v59 = vpop.permute.xlu1 %917 }
 0x316   :  { %v987_v29 = vsub.f32 %v3522_v54, %v918_v59 }
 0x318   :  { %v1005_v49 = vmul.f32 1.442695, %v987_v29 }
 0x319   :  { %v908_v28 = vpop.permute.xlu0 %907 }
 0x31a   :  { %1905 = vpow2.f32 %v1005_v49  ;;  %v985_v46 = vsub.f32 %v3523_v17, %v908_v28  ;;  %v923_v41 = vpop.permute.xlu1 %922 }
 0x31b   :  { %v988_v43 = vsub.f32 %v3524_v2, %v923_v41  ;;  %v3532_v2 = vsel %vm3531_vm12, %v2720_v7, -1e+30  ;;  %vm3556_vm12 = vmmov %vm3537_vm1 }
 0x31c   :  { %v1001_v15 = vmul.f32 1.442695, %v985_v46 }
 0x31d   :  { %v1007_v40 = vmul.f32 1.442695, %v988_v43 }
 0x31e   :  { %1907 = vpow2.f32 %v1001_v15  ;;  %v913_v3 = vpop.permute.xlu1 %912 }
 0x31f   :  { %v986_v30 = vsub.f32 %v3525_v39, %v913_v3  ;;  %1909 = vpow2.f32 %v1007_v40 }
 0x321   :  { %v1003_v55 = vmul.f32 1.442695, %v986_v30 }
 0x323   :  { %1911 = vpow2.f32 %v1003_v55 }
 0x324   :  { %v1906_v19 = vpop.eup %1905 }
 0x325   :  { %1117 = vadd.xlane.f32.xlu1 %v1906_v19 }
 0x328   :  { %v1908_v58 = vpop.eup %1907 }
 0x329   :  { %v938_v32 = vpop.permute.xlu1 %937  ;;  %1113 = vadd.xlane.f32.xlu1 %v1908_v58  ;;  %v1910_v59 = vpop.eup %1909  ;;  %v1340_v58 = vld [vmem:[#allocation5 + $0x10] sm:$0xff] }
 0x32a   :  { %v991_v63 = vsub.f32 %v3526_v35, %v938_v32  ;;  %v1342_v35 = vld [vmem:[#allocation5 + $0x20] sm:$0xff] }
 0x32c   :  { %v1013_v54 = vmul.f32 1.442695, %v991_v63 }
 0x32d   :  { %v1912_v29 = vpop.eup %1911  ;;  %v928_v60 = vpop.permute.xlu1 %927  ;;  %1119 = vadd.xlane.f32.xlu1 %v1910_v59 }
 0x32e   :  { %1913 = vpow2.f32 %v1013_v54  ;;  %v989_v49 = vsub.f32 %v3528_v4, %v928_v60  ;;  %1115 = vadd.xlane.f32.xlu0 %v1912_v29  ;;  %v1344_v4 = vld [vmem:[#allocation5 + $0x30] sm:$0xff] }
 0x330   :  { %v1009_v28 = vmul.f32 1.442695, %v989_v49 }
 0x331   :  { %v943_v17 = vpop.permute.xlu1 %942 }
 0x332   :  { %1915 = vpow2.f32 %v1009_v28  ;;  %v992_v25 = vsub.f32 %v3530_v52, %v943_v17  ;;  %v3541_v28 = vsel %vm3540_vm0, %v2900_v8, -1e+30  ;;  %v3545_v8 = vsel %vm3544_vm4, %v2829_v44, -1e+30  ;;  %vm3574_vm0 = vmmov %vm3537_vm1 }
 0x333   :  { %vm3582_vm4 = vmmov %vm3574_vm0 }
 0x334   :  { %v1015_v46 = vmul.f32 1.442695, %v992_v25  ;;  %vm3591_vm6 = vmmov %vm3574_vm0 }
 0x335   :  { %v933_v41 = vpop.permute.xlu1 %932 }
 0x336   :  { %1917 = vpow2.f32 %v1015_v46  ;;  %v990_v21 = vsub.f32 %v3532_v2, %v933_v41 }
 0x338   :  { %v1914_v43 = vpop.eup %1913  ;;  %v1011_v14 = vmul.f32 1.442695, %v990_v21 }
 0x339   :  { %v958_v15 = vpop.permute.xlu1 %957  ;;  %1125 = vadd.xlane.f32.xlu0 %v1914_v43 }
 0x33a   :  { %1919 = vpow2.f32 %v1011_v14  ;;  %v995_v40 = vsub.f32 %v3534_v27, %v958_v15  ;;  %v3547_v15 = vsel %vm3546_vm11, %v2808_v22, -1e+30 }
 0x33c   :  { %v1916_v56 = vpop.eup %1915  ;;  %v1021_v3 = vmul.f32 1.442695, %v995_v40 }
 0x33d   :  { %v948_v39 = vpop.permute.xlu1 %947  ;;  %1121 = vadd.xlane.f32.xlu0 %v1916_v56 }
 0x33e   :  { %1921 = vpow2.f32 %v1021_v3  ;;  %v993_v7 = vsub.f32 %v3536_v57, %v948_v39  ;;  %v3549_v39 = vsel %vm3548_vm2, %v2917_v62, -1e+30  ;;  %v1339_v62 = vld [vmem:[#allocation5 + $0x8] sm:$0xff]  ;;  %vm3590_vm2 = vmmov %vm3574_vm0 }
 0x340   :  { %v1918_v30 = vpop.eup %1917  ;;  %v1017_v55 = vmul.f32 1.442695, %v993_v7 }
 0x341   :  { %1127 = vadd.xlane.f32.xlu1 %v1918_v30 }
 0x342   :  { %1923 = vpow2.f32 %v1017_v55 }
 0x344   :  { %v1920_v19 = vpop.eup %1919 }
 0x345   :  { %1123 = vadd.xlane.f32.xlu1 %v1920_v19 }
 0x346   :  { %v1359_v38 = vpop.xlane.xlu0 %1358 }
 0x347   :  { %v1388_v9 = vadd.f32 %v1359_v38, %v1340_v58 }
 0x348   :  { %v1922_v32 = vpop.eup %1921 }
 0x349   :  { %1404 = vst.msk [vmem:[#allocation5 + $0x10] sm:$0xff] %vm3537_vm1, %v1388_v9  ;;  %v978_v63 = vpop.permute.xlu1 %977  ;;  %1133 = vadd.xlane.f32.xlu0 %v1922_v32  ;;  %v1343_v9 = vld [vmem:[#allocation5 + $0x28] sm:$0xff] }
 0x34a   :  { %v999_v18 = vsub.f32 %v3538_v20, %v978_v63  ;;  %v1363_v59 = vpop.xlane.xlu0 %1362  ;;  %v1345_v63 = vld [vmem:[#allocation5 + $0x38] sm:$0xff] }
 0x34b   :  { %v1390_v54 = vadd.f32 %v1363_v59, %v1342_v35  ;;  %v1347_v59 = vld [vmem:[#allocation5 + $0x48] sm:$0xff] }
 0x34c   :  { %v1924_v29 = vpop.eup %1923  ;;  %v1029_v60 = vmul.f32 1.442695, %v999_v18 }
 0x34d   :  { %1406 = vst.msk [vmem:[#allocation5 + $0x20] sm:$0xff] %vm3539_vm3, %v1390_v54  ;;  %v968_v49 = vpop.permute.xlu1 %967  ;;  %1129 = vadd.xlane.f32.xlu0 %v1924_v29  ;;  %v1349_v29 = vld [vmem:[#allocation5 + $0x58] sm:$0xff]  ;;  %vm3559_vm3 = vmmov %vm3537_vm1 }
 0x34e   :  { %1925 = vpow2.f32 %v1029_v60  ;;  %v997_v17 = vsub.f32 %v3541_v28, %v968_v49  ;;  %v1367_v52 = vpop.xlane.xlu0 %1366  ;;  %v1348_v60 = vld [vmem:[#allocation5 + $0x50] sm:$0xff] }
 0x34f   :  { %v1392_v33 = vadd.f32 %v1367_v52, %v1344_v4  ;;  %v1351_v52 = vld [vmem:[#allocation5 + $0x68] sm:$0xff] }
 0x350   :  { %v1025_v25 = vmul.f32 1.442695, %v997_v17 }
 0x351   :  { %1408 = vst.msk [vmem:[#allocation5 + $0x30] sm:$0xff] %vm3542_vm9, %v1392_v33  ;;  %v1350_v33 = vld [vmem:[#allocation5 + $0x60] sm:$0xff]  ;;  %vm3578_vm9 = vmmov %vm3574_vm0 }
 0x352   :  { %1927 = vpow2.f32 %v1025_v25  ;;  %v1371_v46 = vpop.xlane.xlu0 %1370 }
 0x353   :  { %v1394_v41 = vadd.f32 %v1371_v46, %v1346_v42 }
 0x355   :  { %1410 = vst.msk [vmem:[#allocation5 + $0x40] sm:$0xff] %vm3543_vm7, %v1394_v41  ;;  %vm3581_vm7 = vmmov %vm3574_vm0 }
 0x358   :  { %v1926_v2 = vpop.eup %1925 }
 0x359   :  { %1141 = vadd.xlane.f32.xlu0 %v1926_v2  ;;  %v3560_v2 = vld [vmem:[#allocation16_spill] sm:$0xff] }
 0x35a   :  { %v953_v21 = vpop.permute.xlu0 %952 }
 0x35b   :  { %v994_v14 = vsub.f32 %v3545_v8, %v953_v21  ;;  %v3561_v21 = vsub.f32 %v3025_v47, %v3560_v2  ;;  %v3563_v8 = vld [vmem:[#allocation19_spill] sm:$0xff] }
 0x35c   :  { %v1928_v43 = vpop.eup %1927 }
 0x35d   :  { %1137 = vadd.xlane.f32.xlu0 %v1928_v43  ;;  %v1019_v3 = vmul.f32 1.442695, %v994_v14  ;;  %v1069_v43 = vmul.f32 1.442695, %v3561_v21  ;;  %v1039_v21 = vld [vmem:[#allocation3 + $0x30] sm:$0xff] }
 0x35e   :  { %v963_v13 = vpop.permute.xlu0 %962 }
 0x35f   :  { %v996_v27 = vsub.f32 %v3547_v15, %v963_v13  ;;  %v3562_v13 = vld [vmem:[#allocation17_spill] sm:$0xff] }
 0x360   :  { %v3564_v14 = vsub.f32 %v3562_v13, %v3563_v8 }
 0x361   :  { %v1023_v40 = vmul.f32 1.442695, %v996_v27  ;;  %1382 = vadd.xlane.f32.xlu0 %v2975_v37  ;;  %v3565_v27 = vld [vmem:[#allocation18_spill] sm:$0xff] }
 0x362   :  { %v983_v56 = vpop.permute.xlu0 %982  ;;  %v1065_v15 = vmul.f32 1.442695, %v3564_v14 }
 0x363   :  { %1929 = vpow2.f32 %v1023_v40  ;;  %v1000_v57 = vsub.f32 %v3549_v39, %v983_v56  ;;  %v3566_v40 = vld [vmem:[#allocation20_spill] sm:$0xff]  ;;  %v3568_v39 = vld [vmem:[#allocation21_spill] sm:$0xff] }
 0x364   :  { %1931 = vpow2.f32 %v1019_v3  ;;  %v3567_v56 = vsub.f32 %v3565_v27, %v3566_v40 }
 0x365   :  { %v1031_v44 = vmul.f32 1.442695, %v1000_v57  ;;  %v3569_v57 = vld [vmem:[#allocation22_spill] sm:$0xff] }
 0x366   :  { %v973_v23 = vpop.permute.xlu0 %972  ;;  %v1071_v3 = vmul.f32 1.442695, %v3567_v56  ;;  %v1037_v56 = vld [vmem:[#allocation3 + $0x20] sm:$0xff] }
 0x367   :  { %v998_v22 = vsub.f32 %v3551_v12, %v973_v23  ;;  %1933 = vpow2.f32 %v1031_v44  ;;  %v3570_v23 = vsub.f32 %v3568_v39, %v3569_v57  ;;  %v3587_v39 = vld [vmem:[#allocation31_spill] sm:$0xff] }
 0x369   :  { %v1027_v7 = vmul.f32 1.442695, %v998_v22  ;;  %v1067_v44 = vmul.f32 1.442695, %v3570_v23  ;;  %v1035_v22 = vld [vmem:[#allocation3 + $0x10] sm:$0xff] }
 0x36b   :  { %1935 = vpow2.f32 %v1027_v7 }
 0x36c   :  { %1937 = vpow2.f32 %v1069_v43  ;;  %v3585_v43 = vld [vmem:[#allocation30_spill] sm:$0xff] }
 0x36d   :  { %v1930_v30 = vpop.eup %1929  ;;  %1939 = vpow2.f32 %v1065_v15 }
 0x36e   :  { %1135 = vadd.xlane.f32.xlu1 %v1930_v30  ;;  %v1932_v37 = vpop.eup %1931  ;;  %1941 = vpow2.f32 %v1071_v3 }
 0x36f   :  { %1943 = vpow2.f32 %v1067_v44 }
 0x371   :  { %v1934_v55 = vpop.eup %1933 }
 0x372   :  { %1131 = vadd.xlane.f32.xlu1 %v1932_v37  ;;  %v1033_v37 = vld [vmem:[#allocation3] sm:$0xff] }
 0x375   :  { %v1936_v36 = vpop.eup %1935 }
 0x376   :  { %1143 = vadd.xlane.f32.xlu1 %v1934_v55  ;;  %v1938_v12 = vpop.eup %1937 }
 0x377   :  { %v1099_v47 = vmul.f32 %v1938_v12, %v1035_v22  ;;  %v1940_v7 = vpop.eup %1939  ;;  %v1040_v22 = vld [vmem:[#allocation3 + $0x38] sm:$0xff] }
 0x37a   :  { %1139 = vadd.xlane.f32.xlu1 %v1936_v36  ;;  %v3571_v36 = vld [vmem:[#allocation24_spill] sm:$0xff] }
 0x37e   :  { %1384 = vadd.xlane.f32.xlu1 %v3010_v5 }
 0x37f   :  { %v1357_v19 = vpop.xlane.xlu1 %1356 }
 0x380   :  { %v1387_v58 = vadd.f32 %v1357_v19, %v1339_v62  ;;  %v3572_v62 = vld [vmem:[#allocation25_spill] sm:$0xff] }
 0x381   :  { %v3573_v19 = vsub.f32 %v3571_v36, %v3572_v62 }
 0x382   :  { %1403 = vst.msk [vmem:[#allocation5 + $0x8] sm:$0xff] %vm3552_vm15, %v1387_v58  ;;  %vm3592_vm15 = vmmov %vm3574_vm0 }
 0x383   :  { %v1361_v48 = vpop.xlane.xlu1 %1360  ;;  %v1077_v58 = vmul.f32 1.442695, %v3573_v19 }
 0x384   :  { %v1389_v38 = vadd.f32 %v1361_v48, %v1341_v51  ;;  %v1097_v51 = vmul.f32 %v1940_v7, %v1033_v37  ;;  %v1942_v48 = vpop.eup %1941  ;;  %v1469_v37 = vld [vmem:[#allocation2] sm:$0xff] }
 0x385   :  { %1945 = vpow2.f32 %v1077_v58  ;;  %v1038_v58 = vld [vmem:[#allocation3 + $0x28] sm:$0xff] }
 0x386   :  { %1405 = vst.msk [vmem:[#allocation5 + $0x18] sm:$0xff] %vm3553_vm13, %v1389_v38  ;;  %vm3594_vm13 = vmmov %vm3574_vm0 }
 0x387   :  { %v1365_v32 = vpop.xlane.xlu1 %1364 }
 0x388   :  { %v1391_v35 = vadd.f32 %v1365_v32, %v1343_v9  ;;  %v1036_v9 = vld [vmem:[#allocation3 + $0x18] sm:$0xff]  ;;  %v1944_v32 = vpop.eup %1943 }
 0x38a   :  { %1407 = vst.msk [vmem:[#allocation5 + $0x28] sm:$0xff] %vm3554_vm8, %v1391_v35  ;;  %vm3595_vm8 = vmmov %vm3574_vm0 }
 0x38b   :  { %v1369_v20 = vpop.xlane.xlu1 %1368 }
 0x38c   :  { %v1393_v18 = vadd.f32 %v1369_v20, %v1345_v63  ;;  %v1034_v63 = vld [vmem:[#allocation3 + $0x8] sm:$0xff]  ;;  %v3575_v20 = vld [vmem:[#allocation26_spill] sm:$0xff] }
 0x38e   :  { %1409 = vst.msk [vmem:[#allocation5 + $0x38] sm:$0xff] %vm3555_vm10, %v1393_v18  ;;  %v3576_v18 = vld [vmem:[#allocation27_spill] sm:$0xff]  ;;  %vm3596_vm10 = vmmov %vm3574_vm0 }
 0x38f   :  { %v1373_v5 = vpop.xlane.xlu1 %1372  ;;  %v1946_v2 = vpop.eup %1945 }
 0x390   :  { %v1395_v54 = vadd.f32 %v1373_v5, %v1347_v59  ;;  %v3577_v59 = vsub.f32 %v3575_v20, %v3576_v18  ;;  %v1103_v14 = vmul.f32 %v1946_v2, %v1039_v21  ;;  %v1043_v20 = vld [vmem:[#allocation3 + $0x50] sm:$0xff] }
 0x392   :  { %1411 = vst.msk [vmem:[#allocation5 + $0x48] sm:$0xff] %vm3556_vm12, %v1395_v54  ;;  %v1073_v5 = vmul.f32 1.442695, %v3577_v59  ;;  %v1100_v54 = vmul.f32 %v1942_v48, %v1036_v9  ;;  %vm3597_vm12 = vmmov %vm3574_vm0 }
 0x393   :  { %v1377_v4 = vpop.xlane.xlu1 %1376  ;;  %v1375_v49 = vpop.xlane.xlu0 %1374 }
 0x394   :  { %v1397_v28 = vadd.f32 %v1377_v4, %v1349_v29  ;;  %v1396_v17 = vadd.f32 %v1375_v49, %v1348_v60  ;;  %v1098_v60 = vmul.f32 %v1944_v32, %v1034_v63  ;;  %1947 = vpow2.f32 %v1073_v5 }
 0x395   :  { %v3593_v5 = vsub.f32 %v3161_v16, %v3172_v50 }
 0x396   :  { %1413 = vst.msk [vmem:[#allocation5 + $0x58] sm:$0xff] %vm3557_vm14, %v1397_v28  ;;  %v3579_v28 = vld [vmem:[#allocation23_spill] sm:$0xff]  ;;  %vm3600_vm14 = vmmov %vm3574_vm0 }
 0x397   :  { %1412 = vst.msk [vmem:[#allocation5 + $0x50] sm:$0xff] %vm3558_vm5, %v1396_v17  ;;  %v1381_v25 = vpop.xlane.xlu1 %1380  ;;  %v1379_v42 = vpop.xlane.xlu0 %1378  ;;  %v3580_v17 = vsub.f32 %v3579_v28, %v3074_v1  ;;  %v3584_v1 = vld [vmem:[#allocation29_spill] sm:$0xff]  ;;  %vm3603_vm5 = vmmov %vm3574_vm0 }
 0x398   :  { %v1399_v46 = vadd.f32 %v1381_v25, %v1351_v52  ;;  %v1398_v41 = vadd.f32 %v1379_v42, %v1350_v33  ;;  %v1421_v25 = vld [vmem:[#allocation5] sm:$0xff]  ;;  %v3583_v42 = vsub.f32 %v3091_v6, %v3098_v11  ;;  %v3586_v13 = vsub.f32 %v3584_v1, %v3585_v43  ;;  %v3588_v6 = vld [vmem:[#allocation33_spill] sm:$0xff] }
 0x399   :  { %v1079_v52 = vmul.f32 1.442695, %v3580_v17  ;;  %vm1437_vm11 = vcmp.eq.f32.partialorder %v1421_v25, 0.0  ;;  %v3589_v11 = vsub.f32 %v3587_v39, %v3588_v6  ;;  %v1041_v17 = vld [vmem:[#allocation3 + $0x40] sm:$0xff]  ;;  %v3604_v6 = vld [vmem:[#allocation34_spill] sm:$0xff] }
 0x39a   :  { %1415 = vst.msk [vmem:[#allocation5 + $0x68] sm:$0xff] %vm3537_vm1, %v1399_v46  ;;  %v1075_v46 = vmul.f32 1.442695, %v3583_v42  ;;  %v1085_v8 = vmul.f32 1.442695, %v3586_v13  ;;  %v1453_v27 = vsel %vm1437_vm11, 1.0, %v1421_v25  ;;  %vm3606_vm1 = vmmov %vm3574_vm0 }
 0x39b   :  { %1414 = vst.msk [vmem:[#allocation5 + $0x60] sm:$0xff] %vm3559_vm3, %v1398_v41  ;;  %1949 = vpow2.f32 %v1079_v52  ;;  %v1081_v57 = vmul.f32 1.442695, %v3589_v11  ;;  %vm3607_vm3 = vmmov %vm3574_vm0 }
 0x39e   :  { %v1948_v15 = vpop.eup %1947 }
 0x39f   :  { %v1101_v23 = vmul.f32 %v1948_v15, %v1037_v56  ;;  %v1352_v15 = vld [vmem:[#allocation5 + $0x70] sm:$0xff] }
 0x3a5   :  { %v1950_v44 = vpop.eup %1949 }
 0x3b2   :  { %v1118_v30 = vpop.xlane.xlu1 %1117 }
 0x3b3   :  { %v1147_v55 = vadd.f32 %v1118_v30, %v1099_v47 }
 0x3b5   :  { %1164 = vst.msk [vmem:[#allocation3 + $0x10] sm:$0xff] %vm3574_vm0, %v1147_v55  ;;  %v1104_v55 = vmul.f32 %v1950_v44, %v1040_v22  ;;  %v1044_v44 = vld [vmem:[#allocation3 + $0x58] sm:$0xff] }
 0x3b6   :  { %v1114_v38 = vpop.xlane.xlu1 %1113 }
 0x3b7   :  { %v1145_v35 = vadd.f32 %v1114_v38, %v1097_v51  ;;  %v1549_v38 = vld [vmem:[#allocation4] sm:$0xff] }
 0x3b9   :  { %1162 = vst.msk [vmem:[#allocation3] sm:$0xff] %vm3578_vm9, %v1145_v35  ;;  %vm3608_vm9 = vmmov %vm3574_vm0 }
 0x3ba   :  { %v1120_v29 = vpop.xlane.xlu1 %1119 }
 0x3bb   :  { %v1148_v4 = vadd.f32 %v1120_v29, %v1100_v54  ;;  %v1116_v49 = vpop.xlane.xlu0 %1115  ;;  %v1093_v54 = vmul.f32 1.442695, %v3593_v5 }
 0x3bc   :  { %v1146_v33 = vadd.f32 %v1116_v49, %v1098_v60 }
 0x3bd   :  { %1165 = vst.msk [vmem:[#allocation3 + $0x18] sm:$0xff] %vm3581_vm7, %v1148_v4  ;;  %vm3609_vm7 = vmmov %vm3574_vm0 }
 0x3be   :  { %1163 = vst.msk [vmem:[#allocation3 + $0x8] sm:$0xff] %vm3582_vm4, %v1146_v33  ;;  %v1089_v33 = vmul.f32 1.442695, %v1061_v31  ;;  %v3598_v31 = vld [vmem:[#allocation28_spill] sm:$0xff]  ;;  %vm3610_vm4 = vmmov %vm3574_vm0 }
 0x3bf   :  { %v3599_v1 = vsub.f32 %v3598_v31, %v3117_v61  ;;  %v3605_v61 = vsub.f32 %v3604_v6, %v3164_v10 }
 0x3c0   :  { %v1485_v41 = vld [vmem:[#allocation3] sm:$0xff] }
 0x3c1   :  { %1951 = vlog2.f32 %v1485_v41  ;;  %v1087_v43 = vmul.f32 1.442695, %v3599_v1  ;;  %v1095_v11 = vmul.f32 1.442695, %v3605_v61 }
 0x3c2   :  { %1953 = vpow2.f32 %v1075_v46  ;;  %v1047_v46 = vld [vmem:[#allocation3 + $0x70] sm:$0xff] }
 0x3c3   :  { %1955 = vpow2.f32 %v1085_v8 }
 0x3c4   :  { %1957 = vrcp.f32 %v1453_v27  ;;  %v3601_v27 = vld [vmem:[#allocation32_spill] sm:$0xff] }
 0x3c5   :  { %1959 = vpow2.f32 %v1081_v57  ;;  %v1091_v57 = vmul.f32 1.442695, %v1062_v24  ;;  %v1046_v24 = vld [vmem:[#allocation3 + $0x68] sm:$0xff] }
 0x3c6   :  { %v1126_v40 = vpop.xlane.xlu0 %1125  ;;  %1961 = vpow2.f32 %v1093_v54 }
 0x3c7   :  { %v1151_v3 = vadd.f32 %v1126_v40, %v1103_v14  ;;  %1963 = vpow2.f32 %v1089_v33  ;;  %v3602_v40 = vsub.f32 %v3601_v27, %v3144_v45 }
 0x3c8   :  { %1965 = vpow2.f32 %v1087_v43 }
 0x3c9   :  { %1168 = vst.msk [vmem:[#allocation3 + $0x30] sm:$0xff] %vm3590_vm2, %v1151_v3  ;;  %v1083_v56 = vmul.f32 1.442695, %v3602_v40 }
 0x3ca   :  { %v1122_v12 = vpop.xlane.xlu0 %1121 }
 0x3cb   :  { %v1952_v47 = vpop.eup %1951  ;;  %v1149_v7 = vadd.f32 %v1122_v12, %v1101_v23  ;;  %1967 = vpow2.f32 %v1083_v56 }
 0x3cc   :  { %v1502_v30 = vmul.f32 0.6931472, %v1952_v47  ;;  %v1954_v36 = vpop.eup %1953  ;;  %1969 = vpow2.f32 %v1095_v11  ;;  %v1042_v47 = vld [vmem:[#allocation3 + $0x48] sm:$0xff] }
 0x3cd   :  { %1166 = vst.msk [vmem:[#allocation3 + $0x20] sm:$0xff] %vm3591_vm6, %v1149_v7  ;;  %v1102_v9 = vmul.f32 %v1954_v36, %v1038_v58  ;;  %v1956_v32 = vpop.eup %1955  ;;  %1971 = vpow2.f32 %v1091_v57 }
 0x3ce   :  { %v1533_v62 = vadd.f32 %v1502_v30, %v1469_v37  ;;  %v1128_v19 = vpop.xlane.xlu1 %1127  ;;  %v1958_v18 = vpop.eup %1957  ;;  %v1107_v60 = vmul.f32 %v1956_v32, %v1043_v20 }
 0x3cf   :  { %v1152_v51 = vadd.f32 %v1128_v19, %v1104_v55  ;;  %v1960_v4 = vpop.eup %1959  ;;  %v1048_v55 = vld [vmem:[#allocation3 + $0x78] sm:$0xff] }
 0x3d0   :  { %v1565_v48 = vmul.f32 %v1533_v62, %v1421_v25  ;;  %v1105_v16 = vmul.f32 %v1960_v4, %v1041_v17  ;;  %v1962_v42 = vpop.eup %1961 }
 0x3d1   :  { %1169 = vst.msk [vmem:[#allocation3 + $0x38] sm:$0xff] %vm3592_vm15, %v1152_v51  ;;  %v1111_v41 = vmul.f32 %v1962_v42, %v1047_v46  ;;  %v1964_v2 = vpop.eup %1963 }
 0x3d2   :  { %v1581_v35 = vsub.f32 %v1549_v38, %v1565_v48  ;;  %v1124_v63 = vpop.xlane.xlu1 %1123  ;;  %v1109_v13 = vmul.f32 %v1964_v2, %v1045_v53  ;;  %v1966_v23 = vpop.eup %1965  ;;  %v1353_v38 = vld [vmem:[#allocation5 + $0x78] sm:$0xff] }
 0x3d3   :  { %v1150_v59 = vadd.f32 %v1124_v63, %v1102_v9  ;;  %v1108_v45 = vmul.f32 %v1966_v23, %v1044_v44 }
 0x3d4   :  { %v1613_v29 = vmul.f32 %v1958_v18, %v1581_v35 }
 0x3d5   :  { %1167 = vst.msk [vmem:[#allocation3 + $0x28] sm:$0xff] %vm3594_vm13, %v1150_v59  ;;  %v1968_v12 = vpop.eup %1967 }
 0x3d6   :  { %v1629_v49 = vmul.f32 -2.0, %v1613_v29  ;;  %v1134_v28 = vpop.xlane.xlu0 %1133  ;;  %v1106_v30 = vmul.f32 %v1968_v12, %v1042_v47  ;;  %v1970_v10 = vpop.eup %1969 }
 0x3d7   :  { %v1155_v52 = vadd.f32 %v1134_v28, %v1107_v60  ;;  %v1112_v62 = vmul.f32 %v1970_v10, %v1048_v55  ;;  %v1972_v0 = vpop.eup %1971 }
 0x3d8   :  { %1677 = vst.msk [vmem:[%s3367_s4] sm:$0xff] %vm3595_vm8, %v1629_v49  ;;  %v1110_v58 = vmul.f32 %v1972_v0, %v1046_v24 }
 0x3d9   :  { %1172 = vst.msk [vmem:[#allocation3 + $0x50] sm:$0xff] %vm3596_vm10, %v1155_v52 }
 0x3da   :  { %v1130_v50 = vpop.xlane.xlu0 %1129 }
 0x3db   :  { %v1153_v25 = vadd.f32 %v1130_v50, %v1105_v16 }
 0x3dd   :  { %1170 = vst.msk [vmem:[#allocation3 + $0x40] sm:$0xff] %vm3597_vm12, %v1153_v25 }
 0x3e6   :  { %v1142_v21 = vpop.xlane.xlu0 %1141 }
 0x3e7   :  { %v1159_v34 = vadd.f32 %v1142_v21, %v1111_v41 }
 0x3e9   :  { %1176 = vst.msk [vmem:[#allocation3 + $0x70] sm:$0xff] %vm3600_vm14, %v1159_v34 }
 0x3ea   :  { %v1138_v8 = vpop.xlane.xlu0 %1137 }
 0x3eb   :  { %v1157_v14 = vadd.f32 %v1138_v8, %v1109_v13 }
 0x3ed   :  { %1174 = vst.msk [vmem:[#allocation3 + $0x60] sm:$0xff] %vm3603_vm5, %v1157_v14 }
 0x3ee   :  { %v1383_v3 = vpop.xlane.xlu0 %1382 }
 0x3ef   :  { %v1400_v39 = vadd.f32 %v1383_v3, %v1352_v15 }
 0x3f1   :  { %1416 = vst.msk [vmem:[#allocation5 + $0x70] sm:$0xff] %vm3606_vm1, %v1400_v39 }
 0x3fb   :  { %v1136_v22 = vpop.xlane.xlu1 %1135 }
 0x3fc   :  { %v1156_v7 = vadd.f32 %v1136_v22, %v1108_v45 }
 0x3fe   :  { %1173 = vst.msk [vmem:[#allocation3 + $0x58] sm:$0xff] %vm3607_vm3, %v1156_v7 }
 0x3ff   :  { %v1132_v37 = vpop.xlane.xlu1 %1131 }
 0x400   :  { %v1154_v36 = vadd.f32 %v1132_v37, %v1106_v30 }
 0x402   :  { %1171 = vst.msk [vmem:[#allocation3 + $0x48] sm:$0xff] %vm3574_vm0, %v1154_v36 }
 0x403   :  { %v1144_v26 = vpop.xlane.xlu1 %1143 }
 0x404   :  { %v1160_v19 = vadd.f32 %v1144_v26, %v1112_v62 }
 0x406   :  { %1177 = vst.msk [vmem:[#allocation3 + $0x78] sm:$0xff] %vm3608_vm9, %v1160_v19 }
 0x407   :  { %v1140_v51 = vpop.xlane.xlu1 %1139 }
 0x408   :  { %v1158_v48 = vadd.f32 %v1140_v51, %v1110_v58 }
 0x40a   :  { %1175 = vst.msk [vmem:[#allocation3 + $0x68] sm:$0xff] %vm3609_vm7, %v1158_v48 }
 0x40b   :  { %v1385_v9 = vpop.xlane.xlu1 %1384 }
 0x40c   :  { %v1401_v32 = vadd.f32 %v1385_v9, %v1353_v38 }
 0x40e   :  { %1417 = vst.msk [vmem:[#allocation5 + $0x78] sm:$0xff] %vm3610_vm4, %v1401_v32 }
 0x40f   :  { %1697 = vsyncpa [#allocation7], 1 }
 0x410   :  { %1698 = vsyncpa [#allocation9], 1 }
 0x411   :  { %1699 = vsyncpa [#allocation12], 1 }

</bundles_post_ra>
